<compile_context>
chip_gen: v7x
topology: tpu7x:2x2x1
jax: 0.10.0
libtpu: 0.0.40
codegen_flags: <defaults>
</compile_context>

<pallas_src>
import math
from functools import partial

import numpy as np
import jax
import jax.numpy as jnp
from jax import lax
from jax.experimental import pallas as pl
from jax.experimental.pallas import tpu as pltpu


# ---------------------------------------------------------------------------
# Pallas kernel: one grid step == one block of `bblk` batch elements.
# ---------------------------------------------------------------------------
def _llra_kernel(x_ref, pt_ref, wv_ref, wsr_ref, bsr_ref, g_ref, beta_ref,
                 wqk_ref, temp_ref, hcol_ref, hrow_ref, wp_ref, bp_ref,
                 o_ref, pool_buf, qk_buf,
                 *, n_tokens, pool_len, lane_stride, bblk, ln_eps):
    f32, bf16 = jnp.float32, jnp.bfloat16
    C = wv_ref.shape[0]
    N, L, Lp = n_tokens, pool_len, lane_stride
    inv_sqrt2 = 1.0 / math.sqrt(2.0)

    # Per-head block-diagonal pattern from two tiny head-id vectors
    # (replaces the (C, C) f32 additive-mask HBM input).
    same_head = hcol_ref[...] == hrow_ref[...]                 # (C,1)==(1,C) -> (C,C)

    # Lane-validity mask for the 128-padded pooled segments (Lp is a pow2).
    lane = lax.broadcasted_iota(jnp.int32, (1, bblk * Lp), 1)
    valid = (lane & (Lp - 1)) < L

    # ---- pooled branch, batched across the whole batch block ---------------
    pool_buf[...] = jnp.zeros_like(pool_buf)
    for b in range(bblk):                  # static & small (bblk <= 4); for
        x_b = x_ref[:, b * N:(b + 1) * N]  # larger bblk use fori_loop / grid.
        pooled = jnp.dot(x_b, pt_ref[...], preferred_element_type=f32)  # (C,L)
        pool_buf[:, b * Lp:b * Lp + L] = pooled.astype(bf16)

    # 1x1 conv -> LayerNorm(channels) -> exact GELU on the whole batch block.
    xs = jnp.dot(wsr_ref[...], pool_buf[...],
                 preferred_element_type=f32) + bsr_ref[...]    # (C, bblk*Lp)
    mu = jnp.mean(xs, axis=0, keepdims=True)
    var = jnp.mean((xs - mu) ** 2, axis=0, keepdims=True)
    xn = (xs - mu) * lax.rsqrt(var + ln_eps) * g_ref[...] + beta_ref[...]
    xg = 0.5 * xn * (1.0 + lax.erf(xn * inv_sqrt2))            # exact GELU
    xg = jnp.where(valid, xg, 0.0).astype(bf16)                # zero the padding

    # Fused q,k projection: one (2C, C) @ (C, bblk*Lp) MXU pass.
    qk_buf[...] = jnp.dot(wqk_ref[...], xg, preferred_element_type=f32)

    wp = wp_ref[...]
    wv = wv_ref[...]
    temp = temp_ref[...]
    bp = bp_ref[...]

    # ---- per-batch channel attention (everything here is tiny: (C,C)) ------
    for b in range(bblk):
        lo = b * Lp
        q_b = qk_buf[0:C, lo:lo + Lp]          # padded lanes are exactly 0,
        k_b = qk_buf[C:2 * C, lo:lo + Lp]      # so 128-wide math == 49-wide.
        qn = q_b * lax.rsqrt(jnp.maximum(
            jnp.sum(q_b * q_b, axis=-1, keepdims=True), 1e-24))
        kn = k_b * lax.rsqrt(jnp.maximum(
            jnp.sum(k_b * k_b, axis=-1, keepdims=True), 1e-24))
        qs = (qn * temp).astype(bf16)          # fold per-head temperature in
        gram = lax.dot_general(qs, kn.astype(bf16),
                               (((1,), (1,)), ((), ())),
                               preferred_element_type=f32)     # (C, C)
        logits = jnp.where(same_head, gram, -1e30)             # block-diagonal
        m = jnp.max(logits, axis=-1, keepdims=True)
        e = jnp.exp(logits - m)
        attn = e * pl.reciprocal(jnp.sum(e, axis=-1, keepdims=True),
                                 approx=True)                  # f32 softmax

        # Fold BOTH projections into the attention matrix (tiny (C,C) matmuls)
        m1 = jnp.dot(wp, attn.astype(bf16), preferred_element_type=f32)
        m2 = jnp.dot(m1.astype(bf16), wv, preferred_element_type=f32)

        # Single big lane-dense MXU pass + lane-dense bf16 store per batch.
        x_b = x_ref[:, b * N:(b + 1) * N]
        o_b = jnp.dot(m2.astype(bf16), x_b, preferred_element_type=f32) + bp
        o_ref[:, b * N:(b + 1) * N] = o_b.astype(o_ref.dtype)


# ---------------------------------------------------------------------------
# Host-side glue
# ---------------------------------------------------------------------------
def _adaptive_pool_matrix(in_size, out_size):
    """Row-stochastic matrix reproducing torch AdaptiveAvgPool windows."""
    P = np.zeros((out_size, in_size), np.float32)
    for i in range(out_size):
        s = (i * in_size) // out_size
        e = -((-(i + 1) * in_size) // out_size)   # ceil
        P[i, s:e] = 1.0 / (e - s)
    return P


def _pick_bblk(B, C, N, Lp, max_bblk, vmem_budget_bytes):
    """Largest divisor of B that fits the VMEM budget and keeps >=2 grid steps."""
    def footprint(d):
        io_blk = C * d * N * 2                             # bf16 (C, d*N)
        scratch = C * d * Lp * 2 + 2 * C * d * Lp * 4      # pool_buf + qk_buf
        consts = (5 * C * C + N * 64 + 16 * C) * 2         # weights + pool mat
        return 4 * io_blk + scratch + 2 * consts           # in/out dbl-buffered
    best = 1
    for d in range(1, min(B, max_bblk) + 1):
        if B % d:
            continue
        if footprint(d) > vmem_budget_bytes:
            continue
        if B >= 2 and B // d < 2:          # keep both v7x TensorCores busy
            continue
        best = d
    return best, footprint(best)


def llra_pallas(x, params, H, W, num_heads=8, pool_size=7, ln_eps=1e-5,
                max_batch_block=4, vmem_budget_bytes=40 * 1024 * 1024):
    B, N, C = x.shape
    assert N == H * W and C % num_heads == 0
    L = pool_size * pool_size
    Lp = max(128, pl.next_power_of_2(L))       # 128-aligned per-batch segment
    assert Lp & (Lp - 1) == 0
    hd = C // num_heads
    bf16 = jnp.bfloat16

    bblk, fp = _pick_bblk(B, C, N, Lp, max_batch_block, vmem_budget_bytes)
    vmem_limit = int(min(max(32 * 2 ** 20, 2 * fp), 48 * 2 ** 20))

    # (N, 49) pooling matrix (transposed so the kernel uses a plain dot).
    P = np.kron(_adaptive_pool_matrix(H, pool_size),
                _adaptive_pool_matrix(W, pool_size))          # (49, N)
    Pt = jnp.asarray(P.T, dtype=bf16)                         # (N, 49)

    # Pre-cast MXU weights to bf16 host-side; keep qk fused as (2C, C).
    wqk = params["wqk"].astype(bf16)
    wv = params["wv"].astype(bf16)
    wsr = params["wsr"].astype(bf16)
    wp = params["wp"].astype(bf16)

    col = lambda a: jnp.asarray(a, jnp.float32).reshape(C, 1)
    temp_col = col(jnp.repeat(params["temperature"].reshape(-1), hd))
    head_ids = jnp.arange(C, dtype=jnp.float32) // hd
    head_col = head_ids.reshape(C, 1)
    head_row = head_ids.reshape(1, C)

    # Channel-major, batch-fused input slab: (C, B*N), bf16.
    # TODO(synk): keep the surrounding layers channel-major (or use
    # CompilerParams(allow_input_fusion)) — in the HBM-bound regime this
    # relayout and the output one below cost as much bandwidth as the kernel.
    x_t = jnp.transpose(x, (2, 0, 1)).reshape(C, B * N).astype(bf16)

    kernel = partial(_llra_kernel, n_tokens=N, pool_len=L, lane_stride=Lp,
                     bblk=bblk, ln_eps=ln_eps)
    const = lambda shape: pl.BlockSpec(shape, lambda i: (0, 0))
    # NOTE: at large C the constant operands can be single-buffered with
    # pipeline_mode=pl.Buffered(1) to save VMEM (noise at small C).

    out_t = pl.pallas_call(
        kernel,
        out_shape=jax.ShapeDtypeStruct((C, B * N), bf16),   # bf16 output
        grid=(B // bblk,),
        in_specs=[
            pl.BlockSpec((C, bblk * N), lambda i: (0, i)),  # x (channel-major)
            const((N, L)),        # pooling matrix (transposed)
            const((C, C)),        # Wv
            const((C, C)),        # Wsr (1x1 conv weight)
            const((C, 1)),        # bsr
            const((C, 1)),        # layernorm gamma
            const((C, 1)),        # layernorm beta
            const((2 * C, C)),    # fused Wqk
            const((C, 1)),        # per-channel head temperature
            const((C, 1)),        # head-id column
            const((1, C)),        # head-id row
            const((C, C)),        # Wproj
            const((C, 1)),        # bproj
        ],
        out_specs=pl.BlockSpec((C, bblk * N), lambda i: (0, i)),
        scratch_shapes=[pltpu.VMEM((C, bblk * Lp), bf16),        # pooled tiles
                        pltpu.VMEM((2 * C, bblk * Lp), jnp.float32)],  # q,k
        compiler_params=pltpu.CompilerParams(
            dimension_semantics=("parallel",),
            vmem_limit_bytes=vmem_limit),
    )(x_t, Pt, wv, wsr, col(params["bsr"]), col(params["gamma"]),
      col(params["beta"]), wqk, temp_col, head_col, head_row, wp,
      col(params["bp"]))

    # layout plumbing back to the module's (B, N, C) convention (bf16)
    return out_t.reshape(C, B, N).transpose(1, 2, 0)


# ---------------------------------------------------------------------------
# Pure-JAX reference mirroring the PyTorch forward (for validation)
# ---------------------------------------------------------------------------
def llra_reference(x, params, H, W, num_heads, pool_size=7):
    hp = lax.Precision.HIGHEST
    B, N, C = x.shape
    hd = C // num_heads
    v = jnp.einsum("bnc,dc->bnd", x, params["wv"], precision=hp)
    v = v.reshape(B, N, num_heads, hd).transpose(0, 2, 1, 3)
    img = x.transpose(0, 2, 1).reshape(B, C, H, W)
    Ph = jnp.asarray(_adaptive_pool_matrix(H, pool_size))
    Pw = jnp.asarray(_adaptive_pool_matrix(W, pool_size))
    pooled = jnp.einsum("oh,bchw,pw->bcop", Ph, img, Pw, precision=hp)
    sr = (jnp.einsum("dc,bcop->bdop", params["wsr"], pooled, precision=hp)
          + params["bsr"][None, :, None, None])
    x_ = sr.reshape(B, C, -1).transpose(0, 2, 1)
    mu = x_.mean(-1, keepdims=True)
    var = ((x_ - mu) ** 2).mean(-1, keepdims=True)
    x_ = (x_ - mu) / jnp.sqrt(var + 1e-5) * params["gamma"] + params["beta"]
    x_ = jax.nn.gelu(x_, approximate=False)
    qk = jnp.einsum("blc,dc->bld", x_, params["wqk"], precision=hp)
    qk = qk.reshape(B, -1, 2, num_heads, hd).transpose(2, 0, 3, 1, 4)
    q, k = qk[0], qk[1]
    q = q.transpose(0, 1, 3, 2)
    k = k.transpose(0, 1, 3, 2)
    v = v.transpose(0, 1, 3, 2)
    q = q / jnp.maximum(jnp.linalg.norm(q, axis=-1, keepdims=True), 1e-12)
    k = k / jnp.maximum(jnp.linalg.norm(k, axis=-1, keepdims=True), 1e-12)
    attn = (jnp.einsum("bhil,bhjl->bhij", q, k, precision=hp)
            * params["temperature"][None, :, None, None])
    attn = jax.nn.softmax(attn, axis=-1)
    out = jnp.einsum("bhij,bhjn->bhin", attn, v, precision=hp)
    out = out.transpose(0, 3, 1, 2).reshape(B, N, C)
    return jnp.einsum("bnc,dc->bnd", out, params["wp"], precision=hp) + params["bp"]


if __name__ == "__main__":
    B, H, W, C, heads = 4, 16, 16, 32, 8
    N = H * W
    key = jax.random.PRNGKey(0)
    ks = jax.random.split(key, 10)
    params = {
        "wv":  0.1 * jax.random.normal(ks[0], (C, C), jnp.float32),
        "wqk": 0.1 * jax.random.normal(ks[1], (2 * C, C), jnp.float32),
        "wsr": 0.1 * jax.random.normal(ks[2], (C, C), jnp.float32),
        "bsr": 0.1 * jax.random.normal(ks[3], (C,), jnp.float32),
        "wp":  0.1 * jax.random.normal(ks[4], (C, C), jnp.float32),
        "bp":  0.1 * jax.random.normal(ks[5], (C,), jnp.float32),
        "gamma": 1.0 + 0.1 * jax.random.normal(ks[6], (C,), jnp.float32),
        "beta":  0.1 * jax.random.normal(ks[7], (C,), jnp.float32),
        "temperature": 1.0 + 0.1 * jax.random.normal(ks[8], (heads,), jnp.float32),
    }
    x = jax.random.normal(ks[9], (B, N, C), jnp.float32)

    out = jax.block_until_ready(llra_pallas(x, params, H, W, num_heads=heads))
    ref = llra_reference(x, params, H, W, heads)

    assert out.shape == (B, N, C)
    err = float(jnp.max(jnp.abs(out.astype(jnp.float32) - ref)))
    assert err < 5e-2, f"max abs err {err}"
    print("KERNEL_OK")
</pallas_src>

<mosaic_0001>
module attributes {stable_mosaic.version = 11 : i64} {
  func.func @_llra_kernel(%arg0: i32, %arg1: memref<32x512xbf16, #tpu.memory_space<vmem>>, %arg2: memref<256x49xbf16, #tpu.memory_space<vmem>>, %arg3: memref<32x32xbf16, #tpu.memory_space<vmem>>, %arg4: memref<32x32xbf16, #tpu.memory_space<vmem>>, %arg5: memref<32x1xf32, #tpu.memory_space<vmem>>, %arg6: memref<32x1xf32, #tpu.memory_space<vmem>>, %arg7: memref<32x1xf32, #tpu.memory_space<vmem>>, %arg8: memref<64x32xbf16, #tpu.memory_space<vmem>>, %arg9: memref<32x1xf32, #tpu.memory_space<vmem>>, %arg10: memref<32x1xf32, #tpu.memory_space<vmem>>, %arg11: memref<1x32xf32, #tpu.memory_space<vmem>>, %arg12: memref<32x32xbf16, #tpu.memory_space<vmem>>, %arg13: memref<32x1xf32, #tpu.memory_space<vmem>>, %arg14: memref<32x512xbf16, #tpu.memory_space<vmem>>, %arg15: memref<32x256xbf16, #tpu.memory_space<vmem>>, %arg16: memref<64x256xf32, #tpu.memory_space<vmem>>) attributes {dimension_semantics = [#tpu.dimension_semantics<parallel>], iteration_bounds = array<i64: 2>, scalar_prefetch = 0 : i64, scratch_operands = 2 : i64, tpu.core_type = #tpu.core_type<tc>, window_params = [{transform_indices = @transform_0, window_bounds = array<i64: 32, 512>}, {pipeline_mode = #tpu.pipeline_mode<synchronous>, transform_indices = @transform_1, window_bounds = array<i64: 256, 49>}, {pipeline_mode = #tpu.pipeline_mode<synchronous>, transform_indices = @transform_2, window_bounds = array<i64: 32, 32>}, {pipeline_mode = #tpu.pipeline_mode<synchronous>, transform_indices = @transform_3, window_bounds = array<i64: 32, 32>}, {pipeline_mode = #tpu.pipeline_mode<synchronous>, transform_indices = @transform_4, window_bounds = array<i64: 32, 1>}, {pipeline_mode = #tpu.pipeline_mode<synchronous>, transform_indices = @transform_5, window_bounds = array<i64: 32, 1>}, {pipeline_mode = #tpu.pipeline_mode<synchronous>, transform_indices = @transform_6, window_bounds = array<i64: 32, 1>}, {pipeline_mode = #tpu.pipeline_mode<synchronous>, transform_indices = @transform_7, window_bounds = array<i64: 64, 32>}, {pipeline_mode = #tpu.pipeline_mode<synchronous>, transform_indices = @transform_8, window_bounds = array<i64: 32, 1>}, {pipeline_mode = #tpu.pipeline_mode<synchronous>, transform_indices = @transform_9, window_bounds = array<i64: 32, 1>}, {pipeline_mode = #tpu.pipeline_mode<synchronous>, transform_indices = @transform_10, window_bounds = array<i64: 1, 32>}, {pipeline_mode = #tpu.pipeline_mode<synchronous>, transform_indices = @transform_11, window_bounds = array<i64: 32, 32>}, {pipeline_mode = #tpu.pipeline_mode<synchronous>, transform_indices = @transform_12, window_bounds = array<i64: 32, 1>}, {transform_indices = @transform_13, window_bounds = array<i64: 32, 512>}]} {
    %c0 = arith.constant 0 : index
    %c0_0 = arith.constant 0 : index
    %0 = vector.load %arg10[%c0, %c0_0] : memref<32x1xf32, #tpu.memory_space<vmem>>, vector<32x1xf32>
    %c0_1 = arith.constant 0 : index
    %c0_2 = arith.constant 0 : index
    %1 = vector.load %arg11[%c0_1, %c0_2] : memref<1x32xf32, #tpu.memory_space<vmem>>, vector<1x32xf32>
    %2 = vector.broadcast %0 : vector<32x1xf32> to vector<32x32xf32>
    %3 = vector.broadcast %1 : vector<1x32xf32> to vector<32x32xf32>
    %4 = arith.cmpf oeq, %2, %3 : vector<32x32xf32>
    %5 = tpu.iota {dimensions = array<i32: 1>} : vector<1x256xi32>
    %c127_i32 = arith.constant 127 : i32
    %6 = vector.broadcast %c127_i32 : i32 to vector<1x256xi32>
    %7 = arith.andi %5, %6 : vector<1x256xi32>
    %c49_i32 = arith.constant 49 : i32
    %8 = vector.broadcast %c49_i32 : i32 to vector<1x256xi32>
    %9 = arith.cmpi slt, %7, %8 : vector<1x256xi32>
    %cst = arith.constant 0.000000e+00 : bf16
    %10 = vector.broadcast %cst : bf16 to vector<32x256xbf16>
    %c0_3 = arith.constant 0 : index
    %c0_4 = arith.constant 0 : index
    %11 = vector.load %arg15[%c0_3, %c0_4] : memref<32x256xbf16, #tpu.memory_space<vmem>>, vector<32x256xbf16>
    tpu.vector_store %arg15[%c0_3, %c0_4], %10 {strides = array<i32>} : memref<32x256xbf16, #tpu.memory_space<vmem>>, vector<32x256xbf16>,
    %c0_5 = arith.constant 0 : index
    %c0_6 = arith.constant 0 : index
    %12 = vector.load %arg1[%c0_5, %c0_6] : memref<32x512xbf16, #tpu.memory_space<vmem>>, vector<32x256xbf16>
    %c0_7 = arith.constant 0 : index
    %c0_8 = arith.constant 0 : index
    %13 = vector.load %arg2[%c0_7, %c0_8] : memref<256x49xbf16, #tpu.memory_space<vmem>>, vector<256x49xbf16>
    %cst_9 = arith.constant dense<0.000000e+00> : vector<32x49xf32>
    %14 = tpu.matmul %12, %13, %cst_9 {dimension_numbers = #tpu.dot_dimension_numbers<[1], [0], [0], [1], [0, 0, 1, 1], [], []>} : vector<32x256xbf16>, vector<256x49xbf16>, vector<32x49xf32> -> vector<32x49xf32>
    %15 = arith.truncf %14 : vector<32x49xf32> to vector<32x49xbf16>
    %c0_10 = arith.constant 0 : index
    %c0_11 = arith.constant 0 : index
    %16 = vector.load %arg15[%c0_10, %c0_11] : memref<32x256xbf16, #tpu.memory_space<vmem>>, vector<32x49xbf16>
    tpu.vector_store %arg15[%c0_10, %c0_11], %15 {strides = array<i32>} : memref<32x256xbf16, #tpu.memory_space<vmem>>, vector<32x49xbf16>,
    %c0_12 = arith.constant 0 : index
    %c256 = arith.constant 256 : index
    %17 = vector.load %arg1[%c0_12, %c256] : memref<32x512xbf16, #tpu.memory_space<vmem>>, vector<32x256xbf16>
    %c0_13 = arith.constant 0 : index
    %c0_14 = arith.constant 0 : index
    %18 = vector.load %arg2[%c0_13, %c0_14] : memref<256x49xbf16, #tpu.memory_space<vmem>>, vector<256x49xbf16>
    %cst_15 = arith.constant dense<0.000000e+00> : vector<32x49xf32>
    %19 = tpu.matmul %17, %18, %cst_15 {dimension_numbers = #tpu.dot_dimension_numbers<[1], [0], [0], [1], [0, 0, 1, 1], [], []>} : vector<32x256xbf16>, vector<256x49xbf16>, vector<32x49xf32> -> vector<32x49xf32>
    %20 = arith.truncf %19 : vector<32x49xf32> to vector<32x49xbf16>
    %c0_16 = arith.constant 0 : index
    %c128 = arith.constant 128 : index
    %21 = vector.load %arg15[%c0_16, %c128] : memref<32x256xbf16, #tpu.memory_space<vmem>>, vector<32x49xbf16>
    tpu.vector_store %arg15[%c0_16, %c128], %20 {strides = array<i32>} : memref<32x256xbf16, #tpu.memory_space<vmem>>, vector<32x49xbf16>,
    %c0_17 = arith.constant 0 : index
    %c0_18 = arith.constant 0 : index
    %22 = vector.load %arg4[%c0_17, %c0_18] : memref<32x32xbf16, #tpu.memory_space<vmem>>, vector<32x32xbf16>
    %c0_19 = arith.constant 0 : index
    %c0_20 = arith.constant 0 : index
    %23 = vector.load %arg15[%c0_19, %c0_20] : memref<32x256xbf16, #tpu.memory_space<vmem>>, vector<32x256xbf16>
    %cst_21 = arith.constant dense<0.000000e+00> : vector<32x256xf32>
    %24 = tpu.matmul %22, %23, %cst_21 {dimension_numbers = #tpu.dot_dimension_numbers<[1], [0], [0], [1], [0, 0, 1, 1], [], []>} : vector<32x32xbf16>, vector<32x256xbf16>, vector<32x256xf32> -> vector<32x256xf32>
    %c0_22 = arith.constant 0 : index
    %c0_23 = arith.constant 0 : index
    %25 = vector.load %arg5[%c0_22, %c0_23] : memref<32x1xf32, #tpu.memory_space<vmem>>, vector<32x1xf32>
    %26 = vector.broadcast %25 : vector<32x1xf32> to vector<32x256xf32>
    %27 = arith.addf %24, %26 : vector<32x256xf32>
    %cst_24 = arith.constant dense<0.000000e+00> : vector<256xf32>
    %28 = vector.multi_reduction <add>, %27, %cst_24 [0] : vector<32x256xf32> to vector<256xf32>
    %29 = vector.shape_cast %28 : vector<256xf32> to vector<1x256xf32>
    %cst_25 = arith.constant 3.200000e+01 : f32
    %30 = vector.broadcast %cst_25 : f32 to vector<1x256xf32>
    %31 = arith.divf %29, %30 : vector<1x256xf32>
    %32 = vector.broadcast %31 : vector<1x256xf32> to vector<32x256xf32>
    %33 = arith.subf %27, %32 : vector<32x256xf32>
    %34 = arith.mulf %33, %33 : vector<32x256xf32>
    %cst_26 = arith.constant dense<0.000000e+00> : vector<256xf32>
    %35 = vector.multi_reduction <add>, %34, %cst_26 [0] : vector<32x256xf32> to vector<256xf32>
    %36 = vector.shape_cast %35 : vector<256xf32> to vector<1x256xf32>
    %cst_27 = arith.constant 3.200000e+01 : f32
    %37 = vector.broadcast %cst_27 : f32 to vector<1x256xf32>
    %38 = arith.divf %36, %37 : vector<1x256xf32>
    %39 = vector.broadcast %31 : vector<1x256xf32> to vector<32x256xf32>
    %40 = arith.subf %27, %39 : vector<32x256xf32>
    %cst_28 = arith.constant 9.99999974E-6 : f32
    %41 = vector.broadcast %cst_28 : f32 to vector<1x256xf32>
    %42 = arith.addf %38, %41 : vector<1x256xf32>
    %43 = math.rsqrt %42 : vector<1x256xf32>
    %44 = vector.broadcast %43 : vector<1x256xf32> to vector<32x256xf32>
    %45 = arith.mulf %40, %44 : vector<32x256xf32>
    %c0_29 = arith.constant 0 : index
    %c0_30 = arith.constant 0 : index
    %46 = vector.load %arg6[%c0_29, %c0_30] : memref<32x1xf32, #tpu.memory_space<vmem>>, vector<32x1xf32>
    %47 = vector.broadcast %46 : vector<32x1xf32> to vector<32x256xf32>
    %48 = arith.mulf %45, %47 : vector<32x256xf32>
    %c0_31 = arith.constant 0 : index
    %c0_32 = arith.constant 0 : index
    %49 = vector.load %arg7[%c0_31, %c0_32] : memref<32x1xf32, #tpu.memory_space<vmem>>, vector<32x1xf32>
    %50 = vector.broadcast %49 : vector<32x1xf32> to vector<32x256xf32>
    %51 = arith.addf %48, %50 : vector<32x256xf32>
    %cst_33 = arith.constant 5.000000e-01 : f32
    %52 = vector.broadcast %cst_33 : f32 to vector<32x256xf32>
    %53 = arith.mulf %52, %51 : vector<32x256xf32>
    %cst_34 = arith.constant 0.707106769 : f32
    %54 = vector.broadcast %cst_34 : f32 to vector<32x256xf32>
    %55 = arith.mulf %51, %54 : vector<32x256xf32>
    %56 = math.erf %55 : vector<32x256xf32>
    %cst_35 = arith.constant 1.000000e+00 : f32
    %57 = vector.broadcast %cst_35 : f32 to vector<32x256xf32>
    %58 = arith.addf %57, %56 : vector<32x256xf32>
    %59 = arith.mulf %53, %58 : vector<32x256xf32>
    %cst_36 = arith.constant 0.000000e+00 : f32
    %60 = vector.shape_cast %9 : vector<1x256xi1> to vector<1x256xi1>
    %61 = vector.broadcast %60 : vector<1x256xi1> to vector<32x256xi1>
    %62 = vector.broadcast %cst_36 : f32 to vector<32x256xf32>
    %63 = arith.select %61, %59, %62 : vector<32x256xi1>, vector<32x256xf32>
    %64 = arith.truncf %63 : vector<32x256xf32> to vector<32x256xbf16>
    %c0_37 = arith.constant 0 : index
    %c0_38 = arith.constant 0 : index
    %65 = vector.load %arg8[%c0_37, %c0_38] : memref<64x32xbf16, #tpu.memory_space<vmem>>, vector<64x32xbf16>
    %cst_39 = arith.constant dense<0.000000e+00> : vector<64x256xf32>
    %66 = tpu.matmul %65, %64, %cst_39 {dimension_numbers = #tpu.dot_dimension_numbers<[1], [0], [0], [1], [0, 0, 1, 1], [], []>} : vector<64x32xbf16>, vector<32x256xbf16>, vector<64x256xf32> -> vector<64x256xf32>
    %c0_40 = arith.constant 0 : index
    %c0_41 = arith.constant 0 : index
    %67 = vector.load %arg16[%c0_40, %c0_41] : memref<64x256xf32, #tpu.memory_space<vmem>>, vector<64x256xf32>
    tpu.vector_store %arg16[%c0_40, %c0_41], %66 {strides = array<i32>} : memref<64x256xf32, #tpu.memory_space<vmem>>, vector<64x256xf32>,
    %c0_42 = arith.constant 0 : index
    %c0_43 = arith.constant 0 : index
    %68 = vector.load %arg12[%c0_42, %c0_43] : memref<32x32xbf16, #tpu.memory_space<vmem>>, vector<32x32xbf16>
    %c0_44 = arith.constant 0 : index
    %c0_45 = arith.constant 0 : index
    %69 = vector.load %arg3[%c0_44, %c0_45] : memref<32x32xbf16, #tpu.memory_space<vmem>>, vector<32x32xbf16>
    %c0_46 = arith.constant 0 : index
    %c0_47 = arith.constant 0 : index
    %70 = vector.load %arg9[%c0_46, %c0_47] : memref<32x1xf32, #tpu.memory_space<vmem>>, vector<32x1xf32>
    %c0_48 = arith.constant 0 : index
    %c0_49 = arith.constant 0 : index
    %71 = vector.load %arg13[%c0_48, %c0_49] : memref<32x1xf32, #tpu.memory_space<vmem>>, vector<32x1xf32>
    %c0_50 = arith.constant 0 : index
    %c0_51 = arith.constant 0 : index
    %72 = vector.load %arg16[%c0_50, %c0_51] : memref<64x256xf32, #tpu.memory_space<vmem>>, vector<32x128xf32>
    %c32 = arith.constant 32 : index
    %c0_52 = arith.constant 0 : index
    %73 = vector.load %arg16[%c32, %c0_52] : memref<64x256xf32, #tpu.memory_space<vmem>>, vector<32x128xf32>
    %74 = arith.mulf %72, %72 : vector<32x128xf32>
    %cst_53 = arith.constant dense<0.000000e+00> : vector<32xf32>
    %75 = vector.multi_reduction <add>, %74, %cst_53 [1] : vector<32x128xf32> to vector<32xf32>
    %76 = vector.shape_cast %75 : vector<32xf32> to vector<32x1xf32>
    %cst_54 = arith.constant 1.000000e-24 : f32
    %77 = vector.broadcast %cst_54 : f32 to vector<32x1xf32>
    %78 = arith.maximumf %76, %77 : vector<32x1xf32>
    %79 = math.rsqrt %78 : vector<32x1xf32>
    %80 = vector.broadcast %79 : vector<32x1xf32> to vector<32x128xf32>
    %81 = arith.mulf %72, %80 : vector<32x128xf32>
    %82 = arith.mulf %73, %73 : vector<32x128xf32>
    %cst_55 = arith.constant dense<0.000000e+00> : vector<32xf32>
    %83 = vector.multi_reduction <add>, %82, %cst_55 [1] : vector<32x128xf32> to vector<32xf32>
    %84 = vector.shape_cast %83 : vector<32xf32> to vector<32x1xf32>
    %cst_56 = arith.constant 1.000000e-24 : f32
    %85 = vector.broadcast %cst_56 : f32 to vector<32x1xf32>
    %86 = arith.maximumf %84, %85 : vector<32x1xf32>
    %87 = math.rsqrt %86 : vector<32x1xf32>
    %88 = vector.broadcast %87 : vector<32x1xf32> to vector<32x128xf32>
    %89 = arith.mulf %73, %88 : vector<32x128xf32>
    %90 = vector.broadcast %70 : vector<32x1xf32> to vector<32x128xf32>
    %91 = arith.mulf %81, %90 : vector<32x128xf32>
    %92 = arith.truncf %91 : vector<32x128xf32> to vector<32x128xbf16>
    %93 = arith.truncf %89 : vector<32x128xf32> to vector<32x128xbf16>
    %cst_57 = arith.constant dense<0.000000e+00> : vector<32x32xf32>
    %94 = tpu.matmul %92, %93, %cst_57 {dimension_numbers = #tpu.dot_dimension_numbers<[1], [1], [0], [0], [0, 0, 1, 0], [], []>} : vector<32x128xbf16>, vector<32x128xbf16>, vector<32x32xf32> -> vector<32x32xf32>
    %cst_58 = arith.constant -1.000000e+30 : f32
    %95 = vector.broadcast %cst_58 : f32 to vector<32x32xf32>
    %96 = arith.select %4, %94, %95 : vector<32x32xi1>, vector<32x32xf32>
    %cst_59 = arith.constant dense<0xFF800000> : vector<32xf32>
    %97 = vector.multi_reduction <maximumf>, %96, %cst_59 [1] : vector<32x32xf32> to vector<32xf32>
    %98 = vector.shape_cast %97 : vector<32xf32> to vector<32x1xf32>
    %99 = vector.broadcast %98 : vector<32x1xf32> to vector<32x32xf32>
    %100 = arith.subf %96, %99 : vector<32x32xf32>
    %101 = math.exp %100 : vector<32x32xf32>
    %cst_60 = arith.constant dense<0.000000e+00> : vector<32xf32>
    %102 = vector.multi_reduction <add>, %101, %cst_60 [1] : vector<32x32xf32> to vector<32xf32>
    %103 = vector.shape_cast %102 : vector<32xf32> to vector<32x1xf32>
    %104 = tpu.reciprocal %103 {approx = true} : vector<32x1xf32> -> vector<32x1xf32>
    %105 = vector.broadcast %104 : vector<32x1xf32> to vector<32x32xf32>
    %106 = arith.mulf %101, %105 : vector<32x32xf32>
    %107 = arith.truncf %106 : vector<32x32xf32> to vector<32x32xbf16>
    %cst_61 = arith.constant dense<0.000000e+00> : vector<32x32xf32>
    %108 = tpu.matmul %68, %107, %cst_61 {dimension_numbers = #tpu.dot_dimension_numbers<[1], [0], [0], [1], [0, 0, 1, 1], [], []>} : vector<32x32xbf16>, vector<32x32xbf16>, vector<32x32xf32> -> vector<32x32xf32>
    %109 = arith.truncf %108 : vector<32x32xf32> to vector<32x32xbf16>
    %cst_62 = arith.constant dense<0.000000e+00> : vector<32x32xf32>
    %110 = tpu.matmul %109, %69, %cst_62 {dimension_numbers = #tpu.dot_dimension_numbers<[1], [0], [0], [1], [0, 0, 1, 1], [], []>} : vector<32x32xbf16>, vector<32x32xbf16>, vector<32x32xf32> -> vector<32x32xf32>
    %c0_63 = arith.constant 0 : index
    %c0_64 = arith.constant 0 : index
    %111 = vector.load %arg1[%c0_63, %c0_64] : memref<32x512xbf16, #tpu.memory_space<vmem>>, vector<32x256xbf16>
    %112 = arith.truncf %110 : vector<32x32xf32> to vector<32x32xbf16>
    %cst_65 = arith.constant dense<0.000000e+00> : vector<32x256xf32>
    %113 = tpu.matmul %112, %111, %cst_65 {dimension_numbers = #tpu.dot_dimension_numbers<[1], [0], [0], [1], [0, 0, 1, 1], [], []>} : vector<32x32xbf16>, vector<32x256xbf16>, vector<32x256xf32> -> vector<32x256xf32>
    %114 = vector.broadcast %71 : vector<32x1xf32> to vector<32x256xf32>
    %115 = arith.addf %113, %114 : vector<32x256xf32>
    %116 = arith.truncf %115 : vector<32x256xf32> to vector<32x256xbf16>
    %c0_66 = arith.constant 0 : index
    %c0_67 = arith.constant 0 : index
    %117 = vector.load %arg14[%c0_66, %c0_67] : memref<32x512xbf16, #tpu.memory_space<vmem>>, vector<32x256xbf16>
    tpu.vector_store %arg14[%c0_66, %c0_67], %116 {strides = array<i32>} : memref<32x512xbf16, #tpu.memory_space<vmem>>, vector<32x256xbf16>,
    %c0_68 = arith.constant 0 : index
    %c128_69 = arith.constant 128 : index
    %118 = vector.load %arg16[%c0_68, %c128_69] : memref<64x256xf32, #tpu.memory_space<vmem>>, vector<32x128xf32>
    %c32_70 = arith.constant 32 : index
    %c128_71 = arith.constant 128 : index
    %119 = vector.load %arg16[%c32_70, %c128_71] : memref<64x256xf32, #tpu.memory_space<vmem>>, vector<32x128xf32>
    %120 = arith.mulf %118, %118 : vector<32x128xf32>
    %cst_72 = arith.constant dense<0.000000e+00> : vector<32xf32>
    %121 = vector.multi_reduction <add>, %120, %cst_72 [1] : vector<32x128xf32> to vector<32xf32>
    %122 = vector.shape_cast %121 : vector<32xf32> to vector<32x1xf32>
    %cst_73 = arith.constant 1.000000e-24 : f32
    %123 = vector.broadcast %cst_73 : f32 to vector<32x1xf32>
    %124 = arith.maximumf %122, %123 : vector<32x1xf32>
    %125 = math.rsqrt %124 : vector<32x1xf32>
    %126 = vector.broadcast %125 : vector<32x1xf32> to vector<32x128xf32>
    %127 = arith.mulf %118, %126 : vector<32x128xf32>
    %128 = arith.mulf %119, %119 : vector<32x128xf32>
    %cst_74 = arith.constant dense<0.000000e+00> : vector<32xf32>
    %129 = vector.multi_reduction <add>, %128, %cst_74 [1] : vector<32x128xf32> to vector<32xf32>
    %130 = vector.shape_cast %129 : vector<32xf32> to vector<32x1xf32>
    %cst_75 = arith.constant 1.000000e-24 : f32
    %131 = vector.broadcast %cst_75 : f32 to vector<32x1xf32>
    %132 = arith.maximumf %130, %131 : vector<32x1xf32>
    %133 = math.rsqrt %132 : vector<32x1xf32>
    %134 = vector.broadcast %133 : vector<32x1xf32> to vector<32x128xf32>
    %135 = arith.mulf %119, %134 : vector<32x128xf32>
    %136 = vector.broadcast %70 : vector<32x1xf32> to vector<32x128xf32>
    %137 = arith.mulf %127, %136 : vector<32x128xf32>
    %138 = arith.truncf %137 : vector<32x128xf32> to vector<32x128xbf16>
    %139 = arith.truncf %135 : vector<32x128xf32> to vector<32x128xbf16>
    %cst_76 = arith.constant dense<0.000000e+00> : vector<32x32xf32>
    %140 = tpu.matmul %138, %139, %cst_76 {dimension_numbers = #tpu.dot_dimension_numbers<[1], [1], [0], [0], [0, 0, 1, 0], [], []>} : vector<32x128xbf16>, vector<32x128xbf16>, vector<32x32xf32> -> vector<32x32xf32>
    %cst_77 = arith.constant -1.000000e+30 : f32
    %141 = vector.broadcast %cst_77 : f32 to vector<32x32xf32>
    %142 = arith.select %4, %140, %141 : vector<32x32xi1>, vector<32x32xf32>
    %cst_78 = arith.constant dense<0xFF800000> : vector<32xf32>
    %143 = vector.multi_reduction <maximumf>, %142, %cst_78 [1] : vector<32x32xf32> to vector<32xf32>
    %144 = vector.shape_cast %143 : vector<32xf32> to vector<32x1xf32>
    %145 = vector.broadcast %144 : vector<32x1xf32> to vector<32x32xf32>
    %146 = arith.subf %142, %145 : vector<32x32xf32>
    %147 = math.exp %146 : vector<32x32xf32>
    %cst_79 = arith.constant dense<0.000000e+00> : vector<32xf32>
    %148 = vector.multi_reduction <add>, %147, %cst_79 [1] : vector<32x32xf32> to vector<32xf32>
    %149 = vector.shape_cast %148 : vector<32xf32> to vector<32x1xf32>
    %150 = tpu.reciprocal %149 {approx = true} : vector<32x1xf32> -> vector<32x1xf32>
    %151 = vector.broadcast %150 : vector<32x1xf32> to vector<32x32xf32>
    %152 = arith.mulf %147, %151 : vector<32x32xf32>
    %153 = arith.truncf %152 : vector<32x32xf32> to vector<32x32xbf16>
    %cst_80 = arith.constant dense<0.000000e+00> : vector<32x32xf32>
    %154 = tpu.matmul %68, %153, %cst_80 {dimension_numbers = #tpu.dot_dimension_numbers<[1], [0], [0], [1], [0, 0, 1, 1], [], []>} : vector<32x32xbf16>, vector<32x32xbf16>, vector<32x32xf32> -> vector<32x32xf32>
    %155 = arith.truncf %154 : vector<32x32xf32> to vector<32x32xbf16>
    %cst_81 = arith.constant dense<0.000000e+00> : vector<32x32xf32>
    %156 = tpu.matmul %155, %69, %cst_81 {dimension_numbers = #tpu.dot_dimension_numbers<[1], [0], [0], [1], [0, 0, 1, 1], [], []>} : vector<32x32xbf16>, vector<32x32xbf16>, vector<32x32xf32> -> vector<32x32xf32>
    %c0_82 = arith.constant 0 : index
    %c256_83 = arith.constant 256 : index
    %157 = vector.load %arg1[%c0_82, %c256_83] : memref<32x512xbf16, #tpu.memory_space<vmem>>, vector<32x256xbf16>
    %158 = arith.truncf %156 : vector<32x32xf32> to vector<32x32xbf16>
    %cst_84 = arith.constant dense<0.000000e+00> : vector<32x256xf32>
    %159 = tpu.matmul %158, %157, %cst_84 {dimension_numbers = #tpu.dot_dimension_numbers<[1], [0], [0], [1], [0, 0, 1, 1], [], []>} : vector<32x32xbf16>, vector<32x256xbf16>, vector<32x256xf32> -> vector<32x256xf32>
    %160 = vector.broadcast %71 : vector<32x1xf32> to vector<32x256xf32>
    %161 = arith.addf %159, %160 : vector<32x256xf32>
    %162 = arith.truncf %161 : vector<32x256xf32> to vector<32x256xbf16>
    %c0_85 = arith.constant 0 : index
    %c256_86 = arith.constant 256 : index
    %163 = vector.load %arg14[%c0_85, %c256_86] : memref<32x512xbf16, #tpu.memory_space<vmem>>, vector<32x256xbf16>
    tpu.vector_store %arg14[%c0_85, %c256_86], %162 {strides = array<i32>} : memref<32x512xbf16, #tpu.memory_space<vmem>>, vector<32x256xbf16>,
    return
  }
  func.func @transform_0(%arg0: i32) -> (i32, i32) {
    %c0_i32 = arith.constant 0 : i32
    %c0_i32_0 = arith.constant 0 : i32
    return %c0_i32, %arg0 : i32, i32
  }
  func.func @transform_1(%arg0: i32) -> (i32, i32) {
    %c0_i32 = arith.constant 0 : i32
    %c0_i32_0 = arith.constant 0 : i32
    %c0_i32_1 = arith.constant 0 : i32
    return %c0_i32, %c0_i32_0 : i32, i32
  }
  func.func @transform_2(%arg0: i32) -> (i32, i32) {
    %c0_i32 = arith.constant 0 : i32
    %c0_i32_0 = arith.constant 0 : i32
    %c0_i32_1 = arith.constant 0 : i32
    return %c0_i32, %c0_i32_0 : i32, i32
  }
  func.func @transform_3(%arg0: i32) -> (i32, i32) {
    %c0_i32 = arith.constant 0 : i32
    %c0_i32_0 = arith.constant 0 : i32
    %c0_i32_1 = arith.constant 0 : i32
    return %c0_i32, %c0_i32_0 : i32, i32
  }
  func.func @transform_4(%arg0: i32) -> (i32, i32) {
    %c0_i32 = arith.constant 0 : i32
    %c0_i32_0 = arith.constant 0 : i32
    %c0_i32_1 = arith.constant 0 : i32
    return %c0_i32, %c0_i32_0 : i32, i32
  }
  func.func @transform_5(%arg0: i32) -> (i32, i32) {
    %c0_i32 = arith.constant 0 : i32
    %c0_i32_0 = arith.constant 0 : i32
    %c0_i32_1 = arith.constant 0 : i32
    return %c0_i32, %c0_i32_0 : i32, i32
  }
  func.func @transform_6(%arg0: i32) -> (i32, i32) {
    %c0_i32 = arith.constant 0 : i32
    %c0_i32_0 = arith.constant 0 : i32
    %c0_i32_1 = arith.constant 0 : i32
    return %c0_i32, %c0_i32_0 : i32, i32
  }
  func.func @transform_7(%arg0: i32) -> (i32, i32) {
    %c0_i32 = arith.constant 0 : i32
    %c0_i32_0 = arith.constant 0 : i32
    %c0_i32_1 = arith.constant 0 : i32
    return %c0_i32, %c0_i32_0 : i32, i32
  }
  func.func @transform_8(%arg0: i32) -> (i32, i32) {
    %c0_i32 = arith.constant 0 : i32
    %c0_i32_0 = arith.constant 0 : i32
    %c0_i32_1 = arith.constant 0 : i32
    return %c0_i32, %c0_i32_0 : i32, i32
  }
  func.func @transform_9(%arg0: i32) -> (i32, i32) {
    %c0_i32 = arith.constant 0 : i32
    %c0_i32_0 = arith.constant 0 : i32
    %c0_i32_1 = arith.constant 0 : i32
    return %c0_i32, %c0_i32_0 : i32, i32
  }
  func.func @transform_10(%arg0: i32) -> (i32, i32) {
    %c0_i32 = arith.constant 0 : i32
    %c0_i32_0 = arith.constant 0 : i32
    %c0_i32_1 = arith.constant 0 : i32
    return %c0_i32, %c0_i32_0 : i32, i32
  }
  func.func @transform_11(%arg0: i32) -> (i32, i32) {
    %c0_i32 = arith.constant 0 : i32
    %c0_i32_0 = arith.constant 0 : i32
    %c0_i32_1 = arith.constant 0 : i32
    return %c0_i32, %c0_i32_0 : i32, i32
  }
  func.func @transform_12(%arg0: i32) -> (i32, i32) {
    %c0_i32 = arith.constant 0 : i32
    %c0_i32_0 = arith.constant 0 : i32
    %c0_i32_1 = arith.constant 0 : i32
    return %c0_i32, %c0_i32_0 : i32, i32
  }
  func.func @transform_13(%arg0: i32) -> (i32, i32) {
    %c0_i32 = arith.constant 0 : i32
    %c0_i32_0 = arith.constant 0 : i32
    return %c0_i32, %arg0 : i32, i32
  }
}

</mosaic_0001>

<bundles_post_ra>
// kernel: tpu_custom_call.1
= control target key start
LH: loop header
LB: loop body
LE: loop exit
PB: predicated region body
PF: predicated region fallthrough
CT: control target
= control target key end

     0   :  { %s3439_s0 = inlined_call_operand.vmem [shape: bf16[32,1024], index: 0, kind: input, shape index: {}]   ;;  %s3440_s1 = inlined_call_operand.vmem [shape: bf16[256,49], index: 1, kind: input, shape index: {}]   ;;  %s3441_s2 = inlined_call_operand.vmem [shape: bf16[32,32], index: 2, kind: input, shape index: {}]   ;;  %s3442_s3 = inlined_call_operand.vmem [shape: bf16[32,32], index: 3, kind: input, shape index: {}]   ;;  %s3443_s4 = inlined_call_operand.vmem [shape: f32[32,1], index: 4, kind: input, shape index: {}]   ;;  %s3444_s5 = inlined_call_operand.vmem [shape: f32[32,1], index: 5, kind: input, shape index: {}]   ;;  %s3445_s6 = inlined_call_operand.vmem [shape: f32[32,1], index: 6, kind: input, shape index: {}]   ;;  %s3446_s7 = inlined_call_operand.vmem [shape: bf16[64,32], index: 7, kind: input, shape index: {}]   ;;  %s3447_s8 = inlined_call_operand.vmem [shape: f32[32,1], index: 8, kind: input, shape index: {}]   ;;  %s3448_s9 = inlined_call_operand.vmem [shape: f32[32,1], index: 9, kind: input, shape index: {}]   ;;  %s3449_s10 = inlined_call_operand.vmem [shape: f32[1,32], index: 10, kind: input, shape index: {}]   ;;  %s3450_s11 = inlined_call_operand.vmem [shape: bf16[32,32], index: 11, kind: input, shape index: {}]   ;;  %s3451_s12 = inlined_call_operand.vmem [shape: f32[32,1], index: 12, kind: input, shape index: {}]   ;;  %s3452_s13 = inlined_call_operand.hbm [shape: bf16[32,1024], index: 13, kind: output, shape index: {}]  }
   0x1   :  { %3455 = sst [smem:[#allocation9_spill]] %s3439_s0 }
   0x2   :  { %3456 = sst [smem:[#allocation10_spill]] %s3440_s1 }
   0x3   :  { %18 = vsyncpa [#allocation6], 0 }
   0x4   :  { %20 = vsyncpa [#allocation6 + $0x1], 0  ;;  %s2866_s25 = smov 0   ;;  %s2868_s26 = smov 0  }
   0x5   :  { %s2870_s27 = smov 0   ;;  %s2872_s28 = smov 0  }
   0x6 LB: > { %s3453_s29 = sadd.s32 4294967295, %s2789_s28   ;;  %s2283_s30 = sadd.s32 4294967294, %s2789_s28   ;;  %s2789_s28 = sphi %s2872_s28, %s3470_s28   ;;  %s2785_s27 = sphi %s2870_s27, %s3469_s27   ;;  %s2781_s26 = sphi %s2868_s26, %s3468_s26   ;;  %s2777_s25 = sphi %s2866_s25, %s3467_s25  }
   0x7   : > { %s2889_s14 = sadd.s32 1, %s2789_s28   ;;  %s33_s15 = sadd.s32 1, %s2785_s27 }
   0x8   : > { %s30_s16 = ssub.s32 %s2789_s28, %s2889_s14  ;;  %p40_p0 = scmp.ne.s32.totalorder %s2785_s27, %s2781_s26 }
   0x9   : > { %p31_p1 = scmp.eq.s32.totalorder %s30_s16, 0  ;;  %p41_p2 = scmp.eq.s32.totalorder %s2789_s28, 0 }
   0xa   : > { %p322_p3 = scmp.eq.s32.totalorder %s3453_s29, 1  ;;  %p327_p4 = scmp.ne.s32.totalorder %s2781_s26, %s2777_s25 }
   0xb   : > { %s2902_s17 = scalar_select %p31_p1, %s2785_s27, %s33_s15  }
   0xc   : > { %p42_p5 = por %p41_p2, %p40_p0  ;;  %p2904_p6 = por %p322_p3, %p40_p0 }
   0xd   : > { %3457 = sst [smem:[#allocation8_spill]] %s2902_s17  ;;  %p328_p7 = scmp.eq.s32.totalorder %s2283_s30, 1 }
   0xe   : > { %p2285_p9 = scmp.ge.s32.totalorder %s2789_s28, 2 }
   0xf   : > { %p2908_p8 = por %p328_p7, %p327_p4 }
  0x10   : > { %380 = sbr.rel (%p2285_p9) target bundleno = 37 (0x25), region = 64 }
  0x17   : > { %383 = sbr.rel (!%p42_p5) target bundleno = 37 (0x25), region = 68  ;;  %s385_s20 = sand.u32 (%p42_p5), 1, %s2785_s27  }
  0x18   : > { %s2394_s21 = sshll.u32 (%p42_p5), %s2789_s28, 4  ;;  %s2286_s22 = sshll.u32 (%p42_p5), %s385_s20, 6 }
  0x19   : > { %s3460_s0 = sld [smem:[#allocation9_spill]] (%p42_p5)  ;;  %s387_s30 = scalar_lea.vmem (%p42_p5), [#allocation4], %s2286_s22 }
  0x1f   : > { %s390_s15 = scalar_lea.vmem %s3460_s0, %s2394_s21 }
  0x20   : > { %v403_v0 = vld [vmem:[%s390_s15] sm:$0xff]  ;;  %v405_v1 = vld [vmem:[%s390_s15 + $0x8] sm:$0xff] }
  0x21   : > { %v407_v2 = vld [vmem:[%s390_s15 + $0x20] sm:$0xff]  ;;  %404 = vst [vmem:[%s387_s30] sm:$0xff] %v403_v0  ;;  %406 = vst [vmem:[%s387_s30 + $0x8] sm:$0xff] %v405_v1  ;;  %v409_v3 = vld [vmem:[%s390_s15 + $0x28] sm:$0xff] }
  0x22   : > { %408 = vst [vmem:[%s387_s30 + $0x10] sm:$0xff] %v407_v2  ;;  %v411_v4 = vld [vmem:[%s390_s15 + $0x40] sm:$0xff]  ;;  %v413_v5 = vld [vmem:[%s390_s15 + $0x48] sm:$0xff]  ;;  %410 = vst [vmem:[%s387_s30 + $0x18] sm:$0xff] %v409_v3 }
  0x23   : > { %412 = vst [vmem:[%s387_s30 + $0x20] sm:$0xff] %v411_v4  ;;  %414 = vst [vmem:[%s387_s30 + $0x28] sm:$0xff] %v413_v5  ;;  %v415_v6 = vld [vmem:[%s390_s15 + $0x60] sm:$0xff]  ;;  %v417_v7 = vld [vmem:[%s390_s15 + $0x68] sm:$0xff] }
  0x24   : > { %416 = vst [vmem:[%s387_s30 + $0x30] sm:$0xff] %v415_v6  ;;  %418 = vst [vmem:[%s387_s30 + $0x38] sm:$0xff] %v417_v7 }
  0x25 PF: > { %p2289_p10 = scmp.ge.s32.totalorder %s2789_s28, 1  ;;  %p423_p11 = scmp.lt.s32.totalorder %s2789_s28, 3 }
  0x27   : > { %p424_p12 = pnand %p2289_p10, %p423_p11 }
  0x28   : > { %s3461_s1 = sld [smem:[#allocation10_spill]] (!%p424_p12)  ;;  %s3454_s0 = sand.u32 (!%p424_p12), 1, %s2781_s26   ;;  %v2791_v48 = vmov (!%p424_p12), 0   ;;  %v943_v49 = vld [vmem:[%s3443_s4 + $0x10] sm:$0xff] (!%p424_p12)  ;;  %v941_v50 = vld [vmem:[%s3443_s4] sm:$0xff] (!%p424_p12)  ;;  %v944_v51 = vld [vmem:[%s3443_s4 + $0x18] sm:$0xff] (!%p424_p12) }
  0x29   : > { %427 = sbr.rel (%p424_p12) target bundleno = 3037 (0xbdd), region = 91  ;;  %s3006_s24 = sshll.u32 (!%p424_p12), %s3454_s0, 6  ;;  %518 = vst [vmem:[#allocation2] sm:$0xff] (!%p424_p12), %v2791_v48  ;;  %519 = vst [vmem:[#allocation2 + $0x8] sm:$0xff] (!%p424_p12), %v2791_v48  ;;  %2576 = vset.pattern.permute.xlu1 (!%p424_p12), %v2791_v48  ;;  %2575 = vset.pattern.permute.xlu0 (!%p424_p12), %v2791_v48  ;;  %v942_v52 = vld [vmem:[%s3443_s4 + $0x8] sm:$0xff] (!%p424_p12)  ;;  %v1104_v54 = vld [vmem:[%s3444_s5] sm:$0xff] (!%p424_p12) }
  0x2a   : > { %s3024_s15 = scalar_lea.vmem (!%p424_p12), [#allocation4], %s3006_s24  ;;  %520 = vst [vmem:[#allocation2 + $0x10] sm:$0xff] (!%p424_p12), %v2791_v48  ;;  %521 = vst [vmem:[#allocation2 + $0x18] sm:$0xff] (!%p424_p12), %v2791_v48  ;;  %957 = vperm.xlu1 (!%p424_p12), %2576, %v943_v49   ;;  %947 = vperm.xlu0 (!%p424_p12), %2575, %v941_v50   ;;  %v1105_v53 = vld [vmem:[%s3444_s5 + $0x8] sm:$0xff] (!%p424_p12)  ;;  %v1136_v56 = vld [vmem:[%s3445_s6] sm:$0xff] (!%p424_p12)  ;;  %vm725_vm0 = vcmask (!%p424_p12), 400384  }
  0x2b   : > { %v2609_v40 = vld [vmem:[%s3024_s15] ss:$16 sps:$4 sm:$0xff] (!%p424_p12)   ;;  %v2611_v41 = vld [vmem:[%s3024_s15 + $0x4] ss:$16 sps:$4 sm:$0xff] (!%p424_p12)   ;;  %v2612_v42 = vld [vmem:[%s3024_s15 + $0x8] ss:$16 sps:$4 sm:$0xff] (!%p424_p12)  }
  0x2c   : > { %v2614_v43 = vld [vmem:[%s3024_s15 + $0xc] ss:$16 sps:$4 sm:$0xff] (!%p424_p12)   ;;  %706 = vmatprep.mubr.bf16.mxu0 (!%p424_p12), %v2611_v41  ;;  %v2615_v44 = vld [vmem:[%s3024_s15 + $0x24] ss:$16 sps:$4 sm:$0xff] (!%p424_p12)   ;;  %v2619_v46 = vld [vmem:[%s3024_s15 + $0x20] ss:$16 sps:$4 sm:$0xff] (!%p424_p12)  }
  0x2d   : > { %912 = vmatprep.mubr.bf16.mxu1 (!%p424_p12), %v2614_v43  ;;  %v2617_v45 = vld [vmem:[%s3024_s15 + $0x2c] ss:$16 sps:$4 sm:$0xff] (!%p424_p12)   ;;  %v2620_v47 = vld [vmem:[%s3024_s15 + $0x28] ss:$16 sps:$4 sm:$0xff] (!%p424_p12)   ;;  %v1106_v58 = vld [vmem:[%s3444_s5 + $0x10] sm:$0xff] (!%p424_p12)  ;;  %vm975_vm1 = vcmask (!%p424_p12), 261120  }
  0x2e   : > { %v2577_v8 = vld [vmem:[%s3461_s1 + $0x40] sm:$0xff] (!%p424_p12)   ;;  %v2581_v12 = vld [vmem:[%s3461_s1 + $0x48] sm:$0xff] (!%p424_p12)   ;;  %v2585_v16 = vld [vmem:[%s3461_s1 + $0x50] sm:$0xff] (!%p424_p12)   ;;  %962 = vperm.xlu1 (!%p424_p12), %2576, %v944_v51   ;;  %952 = vperm.xlu0 (!%p424_p12), %2575, %v942_v52   ;;  %s3351_s17 = scalar_lea.vmem (!%p424_p12), [#allocation5], %s3006_s24  ;;  %s3464_s24 = sadd.s32 (!%p424_p12), 4294967295, %s2789_s28  }
  0x2f   : > { %v2578_v9 = vld [vmem:[%s3461_s1 + $0x40] sm:$0xff] (!%p424_p12)   ;;  %2404 = vmatprep.subr.bf16.mxu0 (!%p424_p12), %v2577_v8  ;;  %v2582_v13 = vld [vmem:[%s3461_s1 + $0x48] sm:$0xff] (!%p424_p12)   ;;  %v2586_v17 = vld [vmem:[%s3461_s1 + $0x50] sm:$0xff] (!%p424_p12)   ;;  %s2215_s0 = sshll.u32 (!%p424_p12), %s3351_s17, 4  ;;  %s3465_s20 = sand.u32 (!%p424_p12), 1, %s2781_s26   ;;  %s3391_s0 = int_to_ptr.vmem [resolvable:$true] %s2215_s0 }
  0x30   : > { %v2579_v10 = vld [vmem:[%s3461_s1] sm:$0xff]   ;;  %2432 = vmatprep.subr.bf16.mxu1 %v2578_v9  ;;  %v2583_v14 = vld [vmem:[%s3461_s1 + $0x8] sm:$0xff]   ;;  %v2587_v18 = vld [vmem:[%s3461_s1 + $0x10] sm:$0xff]   ;;  %s3397_s21 = scalar_lea.sflag [#allocation6], %s3465_s20  ;;  %s2727_s22 = scalar_lea.vmem %s3391_s0, 1024 }
  0x31   : > { %v2580_v11 = vld [vmem:[%s3461_s1] sm:$0xff]   ;;  %2405 = vmatpush3.bf16.msra.mxu0 %v2579_v10  ;;  %v2584_v15 = vld [vmem:[%s3461_s1 + $0x8] sm:$0xff]   ;;  %v2588_v19 = vld [vmem:[%s3461_s1 + $0x10] sm:$0xff]   ;;  %p2728_p13 = scmp.ne.s32.totalorder %s3391_s0, %s2727_s22 }
  0x32   : > { %2433 = vmatpush3.bf16.msra.mxu1 %v2580_v11  ;;  %2406 = vmatprep.subr.bf16.mxu0 %v2581_v12  ;;  %v2589_v20 = vld [vmem:[%s3461_s1 + $0x58] sm:$0xff]   ;;  %v2593_v24 = vld [vmem:[%s3461_s1 + $0x60] sm:$0xff]   ;;  %v2597_v28 = vld [vmem:[%s3461_s1 + $0x68] sm:$0xff]  }
  0x33   : > { %2434 = vmatprep.subr.bf16.mxu1 %v2582_v13  ;;  %v2590_v21 = vld [vmem:[%s3461_s1 + $0x58] sm:$0xff]   ;;  %v2594_v25 = vld [vmem:[%s3461_s1 + $0x60] sm:$0xff]   ;;  %v2598_v29 = vld [vmem:[%s3461_s1 + $0x68] sm:$0xff]   ;;  %1115 = vperm.xlu1 %2576, %v1105_v53   ;;  %p2729_p0 = pnand %p2728_p13, %p2904_p6 }
  0x34   : > { %v2591_v22 = vld [vmem:[%s3461_s1 + $0x18] sm:$0xff]   ;;  %v2595_v26 = vld [vmem:[%s3461_s1 + $0x20] sm:$0xff]   ;;  %v2599_v30 = vld [vmem:[%s3461_s1 + $0x28] sm:$0xff]   ;;  %1110 = vperm.xlu0 %2575, %v1104_v54  }
  0x35   : > { %2407 = vmatpush3.bf16.msra.mxu0 %v2583_v14  ;;  %v2592_v23 = vld [vmem:[%s3461_s1 + $0x18] sm:$0xff]   ;;  %v2596_v27 = vld [vmem:[%s3461_s1 + $0x20] sm:$0xff]   ;;  %v2600_v31 = vld [vmem:[%s3461_s1 + $0x28] sm:$0xff]   ;;  %p2730_p1 = pneg %p2729_p0 }
  0x36   : > { %2435 = vmatpush3.bf16.msra.mxu1 %v2584_v15  ;;  %2408 = vmatprep.subr.bf16.mxu0 %v2585_v16  ;;  %v2601_v32 = vld [vmem:[%s3461_s1 + $0x70] sm:$0xff]   ;;  %v2605_v36 = vld [vmem:[%s3461_s1 + $0x78] sm:$0xff]   ;;  %v1137_v55 = vld [vmem:[%s3445_s6 + $0x8] sm:$0xff] }
  0x37   : > { %2436 = vmatprep.subr.bf16.mxu1 %v2586_v17  ;;  %v2602_v33 = vld [vmem:[%s3461_s1 + $0x70] sm:$0xff]   ;;  %v2606_v37 = vld [vmem:[%s3461_s1 + $0x78] sm:$0xff]   ;;  %1147 = vperm.xlu1 %2576, %v1137_v55   ;;  %v1361_v61 = vld [vmem:[%s3447_s8] sm:$0xff] }
  0x38   : > { %v2603_v34 = vld [vmem:[%s3461_s1 + $0x30] sm:$0xff]   ;;  %v2607_v38 = vld [vmem:[%s3461_s1 + $0x38] sm:$0xff]   ;;  %1142 = vperm.xlu0 %2575, %v1136_v56  }
  0x39   : > { %2409 = vmatpush3.bf16.msra.mxu0 %v2587_v18  ;;  %v2604_v35 = vld [vmem:[%s3461_s1 + $0x30] sm:$0xff]   ;;  %v2608_v39 = vld [vmem:[%s3461_s1 + $0x38] sm:$0xff]   ;;  %s2792_s1 = smov [#allocation5]  }
  0x3a   : > { %2437 = vmatpush3.bf16.msra.mxu1 %v2588_v19  ;;  %2410 = vmatprep.subr.bf16.mxu0 %v2589_v20  ;;  %v1107_v57 = vld [vmem:[%s3444_s5 + $0x18] sm:$0xff]  ;;  %v1138_v60 = vld [vmem:[%s3445_s6 + $0x10] sm:$0xff]  ;;  %s2731_s23 = sshll.u32 %s2792_s1, 4  ;;  %s2732_s23 = int_to_ptr.vmem [resolvable:$false] %s2731_s23 }
  0x3b   : > { %2438 = vmatprep.subr.bf16.mxu1 %v2590_v21  ;;  %1125 = vperm.xlu1 %2576, %v1107_v57   ;;  %v1139_v59 = vld [vmem:[%s3445_s6 + $0x18] sm:$0xff]  ;;  %p2734_p2 = scmp.lt.s32.totalorder %s3391_s0, %s2732_s23 }
  0x3c   : > { %1120 = vperm.xlu0 %2575, %v1106_v58  }
  0x3d   : > { %2411 = vmatpush3.bf16.msra.mxu0 %v2591_v22 }
  0x3e   : > { %2439 = vmatpush3.bf16.msra.mxu1 %v2592_v23  ;;  %2412 = vmatprep.subr.bf16.mxu0 %v2593_v24 }
  0x3f   : > { %2440 = vmatprep.subr.bf16.mxu1 %v2594_v25  ;;  %1157 = vperm.xlu1 %2576, %v1139_v59  }
  0x40   : > { %1152 = vperm.xlu0 %2575, %v1138_v60  }
  0x41   : > { %2413 = vmatpush3.bf16.msra.mxu0 %v2595_v26 }
  0x42   : > { %2441 = vmatpush3.bf16.msra.mxu1 %v2596_v27  ;;  %2414 = vmatprep.subr.bf16.mxu0 %v2597_v28 }
  0x43   : > { %2442 = vmatprep.subr.bf16.mxu1 %v2598_v29  ;;  %1427 = vperm.xlu1 %2576, %v1361_v61  }
  0x45   : > { %2415 = vmatpush3.bf16.msra.mxu0 %v2599_v30  ;;  %v2621_v30 = vld [vmem:[%s3442_s3] sm:$0xff]  }
  0x46   : > { %2443 = vmatpush3.bf16.msra.mxu1 %v2600_v31  ;;  %2416 = vmatprep.subr.bf16.mxu0 %v2601_v32  ;;  %v2622_v31 = vld [vmem:[%s3442_s3 + $0x8] sm:$0xff]  }
  0x47   : > { %2444 = vmatprep.subr.bf16.mxu1 %v2602_v33 }
  0x49   : > { %2417 = vmatpush3.bf16.msra.mxu0 %v2603_v34 }
  0x4a   : > { %2445 = vmatpush3.bf16.msra.mxu1 %v2604_v35  ;;  %2418 = vmatprep.subr.bf16.mxu0 %v2605_v36 }
  0x4b   : > { %2446 = vmatprep.subr.bf16.mxu1 %v2606_v37 }
  0x4d   : > { %2419 = vmatpush3.bf16.msra.mxu0 %v2607_v38 }
  0x4e   : > { %2447 = vmatpush3.bf16.msra.mxu1 %v2608_v39 }
  0x50   : > { %707 = vmatmul.mubr.bf16.vlgmr.msra.gmra.mrb[0].mxu0 %v2609_v40 }
  0x51   : > { %913 = vmatmul.mubr.bf16.vlgmr.msra.gmra.mrb[0].mxu1 %v2612_v42  ;;  %714 = vmatprep.mubr.bf16.mxu0 %v2615_v44 }
  0x52   : > { %920 = vmatprep.mubr.bf16.mxu1 %v2617_v45 }
  0x58   : > { %715 = vmatmul.mubr.bf16.gmra.mrb[4].mxu0 %v2619_v46 }
  0x59   : > { %921 = vmatmul.mubr.bf16.gmra.mrb[4].mxu1 %v2620_v47  ;;  %1014 = vmatprep.mubr.bf16.mxu0 %v2791_v48 }
  0x5a   : > { %1296 = vmatprep.mubr.bf16.mxu1 %v2791_v48 }
  0xa9   : > { %v948_v32 = vpop.permute.xlu0 %947  ;;  %v958_v40 = vpop.permute.xlu1 %957 }
  0xad   : > { %v953_v35 = vpop.permute.xlu0 %952  ;;  %v963_v49 = vpop.permute.xlu1 %962 }
 0x123   : > { %v2420_v62 = vpop.f32.mrb[0].mxu0 }
 0x124   : > { %v2448_v63 = vpop.f32.mrb[0].mxu1  ;;  %v2421_v0 = vpop.f32.mrb[1].mxu0 }
 0x125   : > { %v2422_v1 = vadd.f32 %v2421_v0, %v2420_v62  ;;  %v2449_v2 = vpop.f32.mrb[1].mxu1  ;;  %v2423_v3 = vpop.f32.mrb[2].mxu0 }
 0x126   : > { %v2450_v4 = vadd.f32 %v2449_v2, %v2448_v63  ;;  %v2451_v5 = vpop.f32.mrb[2].mxu1  ;;  %v2424_v6 = vpop.f32.mrb[3].mxu0 }
 0x127   : > { %v2425_v7 = vadd.f32 %v2424_v6, %v2423_v3  ;;  %v2452_v8 = vpop.f32.mrb[3].mxu1 }
 0x128   : > { %v2453_v9 = vadd.f32 %v2452_v8, %v2451_v5 }
 0x129   : > { %v723_v10 = vpack.c.bf16 %v2425_v7, %v2422_v1 }
 0x12a   : > { %v929_v11 = vpack.c.bf16 %v2453_v9, %v2450_v4 }
 0x12b   : > { %726 = vst.msk [vmem:[#allocation2] sm:$0xff] %vm725_vm0, %v723_v10  ;;  %v2426_v12 = vpop.f32.mrb[4].mxu0 }
 0x12c   : > { %931 = vst.msk [vmem:[#allocation2 + $0x8] sm:$0xff] %vm725_vm0, %v929_v11  ;;  %v2454_v13 = vpop.f32.mrb[4].mxu1  ;;  %v2427_v14 = vpop.f32.mrb[5].mxu0 }
 0x12d   : > { %v2428_v15 = vadd.f32 %v2427_v14, %v2426_v12  ;;  %v2455_v16 = vpop.f32.mrb[5].mxu1  ;;  %v2429_v17 = vpop.f32.mrb[6].mxu0 }
 0x12e   : > { %v2456_v18 = vadd.f32 %v2455_v16, %v2454_v13  ;;  %v2457_v19 = vpop.f32.mrb[6].mxu1  ;;  %v2430_v20 = vpop.f32.mrb[7].mxu0 }
 0x12f   : > { %v2431_v21 = vadd.f32 %v2430_v20, %v2429_v17  ;;  %v2458_v22 = vpop.f32.mrb[7].mxu1 }
 0x130   : > { %v2459_v23 = vadd.f32 %v2458_v22, %v2457_v19 }
 0x131   : > { %v724_v24 = vpack.c.bf16 %v2431_v21, %v2428_v15 }
 0x132   : > { %v930_v25 = vpack.c.bf16 %v2459_v23, %v2456_v18  ;;  %v937_v26 = vld [vmem:[#allocation2] sm:$0xff] }
 0x133   : > { %727 = vst.msk [vmem:[#allocation2 + $0x10] sm:$0xff] %vm725_vm0, %v724_v24  ;;  %v938_v27 = vld [vmem:[#allocation2 + $0x8] sm:$0xff] }
 0x134   : > { %932 = vst.msk [vmem:[#allocation2 + $0x18] sm:$0xff] %vm725_vm0, %v930_v25  ;;  %982 = vmatprep.subr.bf16.mxu0 %v938_v27 }
 0x135   : > { %983 = vmatpush1.bf16.msra.mxu0 %v937_v26 }
 0x13a   : > { %v939_v28 = vld [vmem:[#allocation2 + $0x10] sm:$0xff] }
 0x13b   : > { %v940_v29 = vld [vmem:[#allocation2 + $0x18] sm:$0xff] }
 0x13c   : > { %984 = vmatprep.subr.bf16.mxu0 %v940_v29 }
 0x13d   : > { %985 = vmatpush1.bf16.msra.mxu0 %v939_v28 }
 0x140   : > { %2335 = vmatmul.mubr.msk.bf16.vlgmr.msra.gmra.mrb[8].mxu0 %vm975_vm1, %v2621_v30 }
 0x141   : > { %1024 = vmatprep.mubr.bf16.mxu0 %v2791_v48 }
 0x148   : > { %2336 = vmatmul.mubr.msk.bf16.gmra.mrb[12].mxu0 %vm975_vm1, %v2622_v31 }
 0x213   : > { %v1016_v33 = vpop.f32.mrb[8].mxu0 }
 0x214   : > { %v1018_v34 = vpop.f32.mrb[9].mxu0  ;;  %v1017_v37 = vadd.f32 %v1016_v33, %v948_v32 }
 0x215   : > { %v1020_v36 = vpop.f32.mrb[10].mxu0  ;;  %v1019_v41 = vadd.f32 %v1018_v34, %v948_v32 }
 0x216   : > { %v1021_v38 = vadd.f32 %v1020_v36, %v953_v35  ;;  %v1022_v39 = vpop.f32.mrb[11].mxu0 }
 0x217   : > { %v1023_v42 = vadd.f32 %v1022_v39, %v953_v35 }
 0x218   : > { %v1035_v43 = vadd.f32 %v1021_v38, %v1017_v37 }
 0x219   : > { %v1044_v44 = vadd.f32 %v1023_v42, %v1019_v41 }
 0x21b   : > { %v1026_v45 = vpop.f32.mrb[12].mxu0 }
 0x21c   : > { %v1027_v46 = vadd.f32 %v1026_v45, %v958_v40  ;;  %v1028_v47 = vpop.f32.mrb[13].mxu0 }
 0x21d   : > { %v1029_v50 = vadd.f32 %v1028_v47, %v958_v40  ;;  %v1030_v51 = vpop.f32.mrb[14].mxu0 }
 0x21e   : > { %v1036_v52 = vadd.f32 %v1035_v43, %v1027_v46  ;;  %v1031_v53 = vadd.f32 %v1030_v51, %v963_v49  ;;  %v1032_v54 = vpop.f32.mrb[15].mxu0  ;;  %v1116_v43 = vpop.permute.xlu1 %1115 }
 0x21f   : > { %v1045_v55 = vadd.f32 %v1044_v44, %v1029_v50  ;;  %v1033_v56 = vadd.f32 %v1032_v54, %v963_v49 }
 0x220   : > { %v1037_v57 = vadd.f32 %v1036_v52, %v1031_v53 }
 0x221   : > { %v1046_v58 = vadd.f32 %v1045_v55, %v1033_v56  ;;  %v511_v55 = vlaneseq }
 0x222   : > { %v1038_v59 = vrot.slane %v1037_v57, 4 }
 0x223   : > { %v1047_v60 = vrot.slane %v1046_v58, 4 }
 0x224   : > { %v1039_v61 = vadd.f32 %v1038_v59, %v1037_v57 }
 0x225   : > { %v1048_v62 = vadd.f32 %v1047_v60, %v1046_v58 }
 0x226   : > { %v1040_v63 = vrot.slane %v1039_v61, 2 }
 0x227   : > { %v1049_v0 = vrot.slane %v1048_v62, 2 }
 0x228   : > { %v1041_v1 = vadd.f32 %v1040_v63, %v1039_v61 }
 0x229   : > { %v1050_v2 = vadd.f32 %v1049_v0, %v1048_v62 }
 0x22a   : > { %v1042_v3 = vrot.slane %v1041_v1, 1 }
 0x22b   : > { %v1051_v4 = vrot.slane %v1050_v2, 1 }
 0x22c   : > { %v1043_v5 = vadd.f32 %v1042_v3, %v1041_v1 }
 0x22d   : > { %v1052_v6 = vadd.f32 %v1051_v4, %v1050_v2 }
 0x22e   : > { %v1054_v7 = vmul.f32 0.03125, %v1043_v5 }
 0x22f   : > { %v1055_v8 = vmul.f32 0.03125, %v1052_v6 }
 0x230   : > { %v1056_v9 = vsub.f32 %v1017_v37, %v1054_v7  ;;  %v1058_v10 = vsub.f32 %v1021_v38, %v1054_v7  ;;  %v1060_v11 = vsub.f32 %v1027_v46, %v1054_v7  ;;  %v1062_v12 = vsub.f32 %v1031_v53, %v1054_v7  ;;  %v1111_v46 = vpop.permute.xlu0 %1110 }
 0x231   : > { %v1057_v13 = vsub.f32 %v1019_v41, %v1055_v8  ;;  %v1059_v14 = vsub.f32 %v1023_v42, %v1055_v8  ;;  %v1061_v15 = vsub.f32 %v1029_v50, %v1055_v8  ;;  %v1063_v16 = vsub.f32 %v1033_v56, %v1055_v8  ;;  %v1148_v50 = vpop.permute.xlu1 %1147 }
 0x232   : > { %v1064_v17 = vmul.f32 %v1056_v9, %v1056_v9  ;;  %v1066_v18 = vmul.f32 %v1058_v10, %v1058_v10  ;;  %v1068_v21 = vmul.f32 %v1060_v11, %v1060_v11  ;;  %v1070_v25 = vmul.f32 %v1062_v12, %v1062_v12 }
 0x233   : > { %v1065_v19 = vmul.f32 %v1057_v13, %v1057_v13  ;;  %v1067_v20 = vmul.f32 %v1059_v14, %v1059_v14  ;;  %v1069_v23 = vmul.f32 %v1061_v15, %v1061_v15  ;;  %v1071_v27 = vmul.f32 %v1063_v16, %v1063_v16 }
 0x234   : > { %v1072_v22 = vadd.f32 %v1066_v18, %v1064_v17  ;;  %v1143_v51 = vpop.permute.xlu0 %1142 }
 0x235   : > { %v1081_v24 = vadd.f32 %v1067_v20, %v1065_v19  ;;  %v1126_v52 = vpop.permute.xlu1 %1125 }
 0x236   : > { %v1073_v26 = vadd.f32 %v1072_v22, %v1068_v21 }
 0x237   : > { %v1082_v28 = vadd.f32 %v1081_v24, %v1069_v23 }
 0x238   : > { %v1074_v29 = vadd.f32 %v1073_v26, %v1070_v25  ;;  %v1121_v54 = vpop.permute.xlu0 %1120 }
 0x239   : > { %v1083_v30 = vadd.f32 %v1082_v28, %v1071_v27  ;;  %v1158_v5 = vpop.permute.xlu1 %1157 }
 0x23a   : > { %v1075_v31 = vrot.slane %v1074_v29, 4 }
 0x23b   : > { %v1084_v32 = vrot.slane %v1083_v30, 4 }
 0x23c   : > { %v1076_v33 = vadd.f32 %v1075_v31, %v1074_v29  ;;  %v1153_v20 = vpop.permute.xlu0 %1152 }
 0x23d   : > { %v1085_v34 = vadd.f32 %v1084_v32, %v1083_v30 }
 0x23e   : > { %v1077_v35 = vrot.slane %v1076_v33, 2 }
 0x23f   : > { %v1086_v36 = vrot.slane %v1085_v34, 2 }
 0x240   : > { %v1078_v37 = vadd.f32 %v1077_v35, %v1076_v33  ;;  %v1364_v33 = vld [vmem:[%s3447_s8 + $0x18] sm:$0xff] }
 0x241   : > { %v1087_v38 = vadd.f32 %v1086_v36, %v1085_v34 }
 0x242   : > { %v1079_v39 = vrot.slane %v1078_v37, 1 }
 0x243   : > { %v1088_v40 = vrot.slane %v1087_v38, 1 }
 0x244   : > { %v1080_v41 = vadd.f32 %v1079_v39, %v1078_v37 }
 0x245   : > { %v1089_v42 = vadd.f32 %v1088_v40, %v1087_v38 }
 0x246   : > { %v1090_v44 = vmul.f32 0.03125, %v1080_v41 }
 0x247   : > { %v1091_v45 = vmul.f32 0.03125, %v1089_v42 }
 0x248   : > { %v1092_v47 = vadd.f32 1e-05, %v1090_v44 }
 0x249   : > { %v1093_v49 = vadd.f32 1e-05, %v1091_v45 }
 0x24a   : > { %2643 = vrsqrt.f32 %v1092_v47 }
 0x24b   : > { %2645 = vrsqrt.f32 %v1093_v49 }
 0x254   : > { %v2644_v53 = vpop.eup %2643 }
 0x255   : > { %v2646_v56 = vpop.eup %2645  ;;  %v1096_v57 = vmul.f32 %v2644_v53, %v1056_v9  ;;  %v1098_v58 = vmul.f32 %v2644_v53, %v1058_v10  ;;  %v1100_v59 = vmul.f32 %v2644_v53, %v1060_v11  ;;  %v1102_v60 = vmul.f32 %v2644_v53, %v1062_v12 }
 0x256   : > { %v1097_v61 = vmul.f32 %v2646_v56, %v1057_v13  ;;  %v1099_v62 = vmul.f32 %v2646_v56, %v1059_v14  ;;  %v1101_v63 = vmul.f32 %v2646_v56, %v1061_v15  ;;  %v1103_v0 = vmul.f32 %v2646_v56, %v1063_v16 }
 0x257   : > { %v1128_v1 = vmul.f32 %v1111_v46, %v1096_v57  ;;  %v1130_v2 = vmul.f32 %v1116_v43, %v1098_v58  ;;  %v1132_v3 = vmul.f32 %v1121_v54, %v1100_v59  ;;  %v1134_v4 = vmul.f32 %v1126_v52, %v1102_v60 }
 0x258   : > { %v1135_v6 = vmul.f32 %v1126_v52, %v1103_v0  ;;  %v1129_v7 = vmul.f32 %v1111_v46, %v1097_v61  ;;  %v1131_v8 = vmul.f32 %v1116_v43, %v1099_v62  ;;  %v1133_v17 = vmul.f32 %v1121_v54, %v1101_v63 }
 0x259   : > { %v1166_v18 = vadd.f32 %v1158_v5, %v1134_v4  ;;  %v1160_v19 = vadd.f32 %v1143_v51, %v1128_v1  ;;  %v1162_v12 = vadd.f32 %v1148_v50, %v1130_v2  ;;  %v512_v16 = vand.u32 127, %v511_v55  ;;  %v2623_v4 = vld [vmem:[%s3446_s7] sm:$0xff]  }
 0x25a   : > { %v1167_v9 = vadd.f32 %v1158_v5, %v1135_v6  ;;  %v1161_v10 = vadd.f32 %v1143_v51, %v1129_v7  ;;  %v1163_v11 = vadd.f32 %v1148_v50, %v1131_v8  ;;  %v1165_v14 = vadd.f32 %v1153_v20, %v1133_v17  ;;  %v2624_v5 = vld [vmem:[%s3446_s7 + $0x8] sm:$0xff]   ;;  %v2625_v6 = vld [vmem:[%s3446_s7 + $0x10] sm:$0xff]   ;;  %v2626_v7 = vld [vmem:[%s3446_s7 + $0x18] sm:$0xff]  }
 0x25b   : > { %v1182_v13 = vmul.f32 0.70710677, %v1166_v18  ;;  %v1164_v21 = vadd.f32 %v1153_v20, %v1132_v3  ;;  %v1176_v24 = vmul.f32 0.70710677, %v1160_v19  ;;  %v1178_v25 = vmul.f32 0.70710677, %v1162_v12 }
 0x25c   : > { %v1183_v15 = vmul.f32 0.70710677, %v1167_v9  ;;  %v1177_v22 = vmul.f32 0.70710677, %v1161_v10  ;;  %v1179_v23 = vmul.f32 0.70710677, %v1163_v11 }
 0x25d   : > { %2647 = verf.f32 %v1182_v13  ;;  %v1181_v26 = vmul.f32 0.70710677, %v1165_v14  ;;  %v1180_v27 = vmul.f32 0.70710677, %v1164_v21  ;;  %v513_v28 = vadd.s32 128, %v512_v16 }
 0x25e   : > { %2649 = verf.f32 %v1183_v15  ;;  %v1169_v35 = vmul.f32 0.5, %v1161_v10  ;;  %vm516_vm3 = vcmp.lt.s32.totalorder %v512_v16, 49  ;;  %v1174_v39 = vmul.f32 0.5, %v1166_v18 }
 0x25f   : > { %2651 = verf.f32 %v1177_v22  ;;  %v515_v29 = vand.u32 127, %v513_v28  ;;  %v1171_v41 = vmul.f32 0.5, %v1163_v11  ;;  %v1175_v44 = vmul.f32 0.5, %v1167_v9  ;;  %vm2344_vm5 = vmpackc.low %vm516_vm3, %vm516_vm3 }
 0x260   : > { %2653 = verf.f32 %v1179_v23  ;;  %v1168_v46 = vmul.f32 0.5, %v1160_v19  ;;  %v1170_v51 = vmul.f32 0.5, %v1162_v12  ;;  %v1173_v53 = vmul.f32 0.5, %v1165_v14 }
 0x261   : > { %2655 = verf.f32 %v1176_v24  ;;  %vm3094_vm2 = vcmp.lt.s32.totalorder %v515_v29, 49  ;;  %v1172_v58 = vmul.f32 0.5, %v1164_v21 }
 0x262   : > { %2657 = verf.f32 %v1178_v25  ;;  %vm2341_vm4 = vmpackc.low %vm3094_vm2, %vm3094_vm2 }
 0x263   : > { %2659 = verf.f32 %v1181_v26 }
 0x264   : > { %2661 = verf.f32 %v1180_v27 }
 0x267   : > { %v2648_v30 = vpop.eup %2647 }
 0x268   : > { %v2650_v31 = vpop.eup %2649  ;;  %v1198_v40 = vadd.f32 1.0, %v2648_v30 }
 0x269   : > { %v2652_v32 = vpop.eup %2651  ;;  %v1199_v37 = vadd.f32 1.0, %v2650_v31 }
 0x26a   : > { %v2654_v34 = vpop.eup %2653  ;;  %v1193_v36 = vadd.f32 1.0, %v2652_v32  ;;  %v1206_v59 = vmul.f32 %v1198_v40, %v1174_v39  ;;  %v1363_v32 = vld [vmem:[%s3447_s8 + $0x10] sm:$0xff]  ;;  %v3194_v39 = vpop.permute.xlu1 %1427 }
 0x26b   : > { %v2656_v38 = vpop.eup %2655  ;;  %v1195_v42 = vadd.f32 1.0, %v2654_v34  ;;  %v1207_v57 = vmul.f32 %v1199_v37, %v1175_v44  ;;  %v477_v34 = vld [vmem:[%s3448_s9 + $0x8] sm:$0xff]  ;;  %v476_v37 = vld [vmem:[%s3448_s9] sm:$0xff] }
 0x26c   : > { %v2658_v43 = vpop.eup %2657  ;;  %v1201_v45 = vmul.f32 %v1193_v36, %v1169_v35  ;;  %v1192_v47 = vadd.f32 1.0, %v2656_v38  ;;  %v479_v35 = vld [vmem:[%s3448_s9 + $0x18] sm:$0xff]  ;;  %v1362_v36 = vld [vmem:[%s3447_s8 + $0x8] sm:$0xff]  ;;  %v478_v38 = vld [vmem:[%s3448_s9 + $0x10] sm:$0xff] }
 0x26d   : > { %v2660_v49 = vpop.eup %2659  ;;  %v1203_v50 = vmul.f32 %v1195_v42, %v1171_v41  ;;  %v1194_v52 = vadd.f32 1.0, %v2658_v43 }
 0x26e   : > { %v2662_v54 = vpop.eup %2661  ;;  %v1200_v55 = vmul.f32 %v1192_v47, %v1168_v46  ;;  %v1197_v56 = vadd.f32 1.0, %v2660_v49 }
 0x26f   : > { %v2342_v60 = vpack.c.bf16 %v1203_v50, %v1201_v45  ;;  %v1202_v61 = vmul.f32 %v1194_v52, %v1170_v51  ;;  %v1196_v62 = vadd.f32 1.0, %v2662_v54 }
 0x270   : > { %v1205_v63 = vmul.f32 %v1197_v56, %v1173_v53 }
 0x271   : > { %2343 = vmatprep.subr.msk.bf16.mxu1 %vm2341_vm4, %v2342_v60  ;;  %v2345_v0 = vpack.c.bf16 %v1202_v61, %v1200_v55  ;;  %v1204_v1 = vmul.f32 %v1196_v62, %v1172_v58 }
 0x272   : > { %v2348_v2 = vpack.c.bf16 %v1207_v57, %v1205_v63 }
 0x273   : > { %2346 = vmatpush1.bf16.msk.msra.mxu1 %vm2344_vm5, %v2345_v0  ;;  %v2351_v3 = vpack.c.bf16 %v1206_v59, %v1204_v1 }
 0x274   : > { %2349 = vmatprep.subr.msk.bf16.mxu1 %vm2341_vm4, %v2348_v2 }
 0x277   : > { %2352 = vmatpush1.bf16.msk.msra.mxu1 %vm2344_vm5, %v2351_v3 }
 0x27a   : > { %2353 = vmatmul.mubr.msk.bf16.vlgmr.msra.gmra.mrb[8].mxu1 %vm975_vm1, %v2623_v4 }
 0x27b   : > { %1306 = vmatprep.mubr.bf16.mxu1 %v2791_v48 }
 0x282   : > { %2354 = vmatmul.mubr.msk.bf16.gmra.mrb[12].mxu1 %vm975_vm1, %v2624_v5 }
 0x283   : > { %1316 = vmatprep.mubr.bf16.mxu1 %v2791_v48 }
 0x28a   : > { %2355 = vmatmul.mubr.msk.bf16.gmra.mrb[16].mxu1 %vm975_vm1, %v2625_v6 }
 0x28b   : > { %1326 = vmatprep.mubr.bf16.mxu1 %v2791_v48 }
 0x292   : > { %2356 = vmatmul.mubr.msk.bf16.gmra.mrb[20].mxu1 %vm975_vm1, %v2626_v7 }
 0x293   : > { %1770 = vmatprep.mubr.bf16.mxu1 %v2791_v48 }
 0x34d   : > { %v3133_v8 = vpop.f32.mrb[8].mxu1 }
 0x34e   : > { %v3135_v17 = vpop.f32.mrb[9].mxu1  ;;  %v1377_v18 = vmul.f32 %v3133_v8, %v3133_v8 }
 0x34f   : > { %v3139_v19 = vpop.f32.mrb[10].mxu1 }
 0x350   : > { %1381 = vadd.xlane.f32.xlu1 %v1377_v18  ;;  %v3141_v20 = vpop.f32.mrb[11].mxu1  ;;  %v1378_v9 = vmul.f32 %v3139_v19, %v3139_v19 }
 0x352   : > { %1383 = vadd.xlane.f32.xlu0 %v1378_v9 }
 0x355   : > { %v1308_v10 = vpop.f32.mrb[12].mxu1 }
 0x356   : > { %v3145_v11 = vpop.f32.mrb[13].mxu1  ;;  %v1379_v12 = vmul.f32 %v1308_v10, %v1308_v10 }
 0x357   : > { %v1312_v13 = vpop.f32.mrb[14].mxu1 }
 0x358   : > { %1385 = vadd.xlane.f32.xlu1 %v1379_v12  ;;  %v3147_v14 = vpop.f32.mrb[15].mxu1  ;;  %v1380_v15 = vmul.f32 %v1312_v13, %v1312_v13 }
 0x35a   : > { %1387 = vadd.xlane.f32.xlu0 %v1380_v15 }
 0x35d   : > { %v3149_v16 = vpop.f32.mrb[16].mxu1 }
 0x35e   : > { %v3151_v21 = vpop.f32.mrb[17].mxu1  ;;  %v1401_v22 = vmul.f32 %v3149_v16, %v3149_v16 }
 0x35f   : > { %v3155_v23 = vpop.f32.mrb[18].mxu1 }
 0x360   : > { %1405 = vadd.xlane.f32.xlu0 %v1401_v22  ;;  %v3157_v24 = vpop.f32.mrb[19].mxu1  ;;  %v1402_v25 = vmul.f32 %v3155_v23, %v3155_v23 }
 0x362   : > { %1407 = vadd.xlane.f32.xlu1 %v1402_v25 }
 0x365   : > { %v3161_v26 = vpop.f32.mrb[20].mxu1 }
 0x366   : > { %v3163_v27 = vpop.f32.mrb[21].mxu1  ;;  %v1403_v28 = vmul.f32 %v3161_v26, %v3161_v26 }
 0x367   : > { %v3167_v29 = vpop.f32.mrb[22].mxu1 }
 0x368   : > { %1409 = vadd.xlane.f32.xlu0 %v1403_v28  ;;  %v3169_v30 = vpop.f32.mrb[23].mxu1  ;;  %v1404_v31 = vmul.f32 %v3167_v29, %v3167_v29 }
 0x36c   : > { %1411 = vadd.xlane.f32.xlu0 %v1404_v31 }
 0x373   : > { %1437 = vperm.xlu1 %2576, %v1363_v32   ;;  %v3219_v32 = vld [vmem:[%s3449_s10] ss:$0 sm:$0xff] }
 0x377   : > { %1442 = vperm.xlu1 %2576, %v1364_v33  }
 0x37b   : > { %488 = vperm.xlu1 %2576, %v477_v34  }
 0x37f   : > { %498 = vperm.xlu1 %2576, %v479_v35  }
 0x382   : > { %1432 = vperm.xlu0 %2575, %v1362_v36  }
 0x386   : > { %483 = vperm.xlu0 %2575, %v476_v37  }
 0x38a   : > { %493 = vperm.xlu0 %2575, %v478_v38  }
 0x3dd   : > { %v1382_v40 = vpop.xlane.xlu1 %1381 }
 0x3de   : > { %v1389_v46 = vmax.f32 %v1382_v40, 1e-24 }
 0x3df   : > { %v1384_v41 = vpop.xlane.xlu0 %1383 }
 0x3e0   : > { %v1390_v50 = vmax.f32 %v1384_v41, 1e-24 }
 0x3e5   : > { %v1386_v42 = vpop.xlane.xlu1 %1385 }
 0x3e6   : > { %v1391_v43 = vmax.f32 %v1386_v42, 1e-24 }
 0x3e7   : > { %v1388_v44 = vpop.xlane.xlu0 %1387 }
 0x3e8   : > { %2663 = vrsqrt.f32 %v1391_v43  ;;  %v1392_v45 = vmax.f32 %v1388_v44, 1e-24 }
 0x3ea   : > { %2665 = vrsqrt.f32 %v1392_v45 }
 0x3ed   : > { %v1406_v47 = vpop.xlane.xlu0 %1405 }
 0x3ee   : > { %v1413_v49 = vmax.f32 %v1406_v47, 1e-24 }
 0x3ef   : > { %v1408_v51 = vpop.xlane.xlu1 %1407 }
 0x3f0   : > { %2667 = vrsqrt.f32 %v1413_v49  ;;  %v1414_v52 = vmax.f32 %v1408_v51, 1e-24 }
 0x3f1   : > { %2669 = vrsqrt.f32 %v1389_v46 }
 0x3f2   : > { %v2664_v53 = vpop.eup %2663  ;;  %2671 = vrsqrt.f32 %v1414_v52 }
 0x3f3   : > { %2673 = vrsqrt.f32 %v1390_v50  ;;  %v3196_v54 = vpop.permute.xlu1 %1437  ;;  %v1399_v56 = vmul.f32 %v2664_v53, %v1308_v10 }
 0x3f4   : > { %v2666_v55 = vpop.eup %2665 }
 0x3f5   : > { %v1410_v57 = vpop.xlane.xlu0 %1409  ;;  %v1400_v58 = vmul.f32 %v2666_v55, %v1312_v13  ;;  %v1447_v61 = vmul.f32 %v3196_v54, %v1399_v56 }
 0x3f6   : > { %v1415_v59 = vmax.f32 %v1410_v57, 1e-24 }
 0x3f7   : > { %v3198_v60 = vpop.permute.xlu1 %1442 }
 0x3f8   : > { %v1448_v62 = vmul.f32 %v3198_v60, %v1400_v58  ;;  %2675 = vrsqrt.f32 %v1415_v59 }
 0x3f9   : > { %v1412_v63 = vpop.xlane.xlu0 %1411 }
 0x3fa   : > { %v2668_v0 = vpop.eup %2667  ;;  %v1450_v1 = vpack.c.bf16 %v1448_v62, %v1447_v61  ;;  %v1416_v2 = vmax.f32 %v1412_v63, 1e-24 }
 0x3fb   : > { %v2670_v3 = vpop.eup %2669  ;;  %v1421_v6 = vmul.f32 %v2668_v0, %v3149_v16  ;;  %v3214_v31 = vpop.permute.xlu1 %488 }
 0x3fc   : > { %v2672_v4 = vpop.eup %2671  ;;  %2677 = vrsqrt.f32 %v1416_v2  ;;  %v1397_v18 = vmul.f32 %v2670_v3, %v3133_v8  ;;  %vm508_vm7 = vcmp.eq.f32.partialorder %v3214_v31, %v3219_v32 }
 0x3fd   : > { %v2674_v5 = vpop.eup %2673  ;;  %v1422_v7 = vmul.f32 %v2672_v4, %v3155_v23  ;;  %v1851_v4 = vmul.f32 %v3151_v21, %v3151_v21 }
 0x3fe   : > { %v1398_v10 = vmul.f32 %v2674_v5, %v3139_v19  ;;  %v1445_v13 = vmul.f32 %v3194_v39, %v1397_v18  ;;  %v1827_v18 = vmul.f32 %v3135_v17, %v3135_v17 }
 0x3ff   : > { %v1451_v9 = vpack.c.bf16 %v1422_v7, %v1421_v6  ;;  %v3233_v38 = vpop.permute.xlu1 %498  ;;  %v1853_v6 = vmul.f32 %v3163_v27, %v3163_v27  ;;  %v1852_v7 = vmul.f32 %v3157_v24, %v3157_v24 }
 0x400   : > { %vm510_vm9 = vcmp.eq.f32.partialorder %v3233_v38, %v3219_v32 }
 0x401   : > { %2484 = vmatprep.subr.bf16.mxu0 %v1451_v9  ;;  %v3206_v12 = vpop.permute.xlu0 %1432 }
 0x402   : > { %v1446_v15 = vmul.f32 %v3206_v12, %v1398_v10  ;;  %2485 = vmatpush3.bf16.xpose.msra.mxu0 %v1451_v9  ;;  %v2676_v22 = vpop.eup %2675  ;;  %v1854_v9 = vmul.f32 %v3169_v30, %v3169_v30  ;;  %v1829_v10 = vmul.f32 %v3145_v11, %v3145_v11 }
 0x403   : > { %v1423_v16 = vmul.f32 %v2676_v22, %v3161_v26  ;;  %v3272_v22 = vld [vmem:[%s3450_s11] sm:$0xff]  }
 0x404   : > { %v1449_v25 = vpack.c.bf16 %v1446_v15, %v1445_v13  ;;  %v1828_v13 = vmul.f32 %v3141_v20, %v3141_v20  ;;  %v1830_v15 = vmul.f32 %v3147_v14, %v3147_v14 }
 0x405   : > { %v3212_v19 = vpop.permute.xlu0 %483 }
 0x406   : > { %v2678_v28 = vpop.eup %2677  ;;  %2488 = vmatprep.mubr.bf16.mxu0 %v1449_v25  ;;  %vm507_vm6 = vcmp.eq.f32.partialorder %v3212_v19, %v3219_v32 }
 0x407   : > { %v1424_v23 = vmul.f32 %v2678_v28, %v3167_v29 }
 0x409   : > { %v1452_v8 = vpack.c.bf16 %v1424_v23, %v1423_v16  ;;  %v3221_v33 = vpop.permute.xlu0 %493 }
 0x40a   : > { %vm509_vm8 = vcmp.eq.f32.partialorder %v3221_v33, %v3219_v32 }
 0x40b   : > { %2486 = vmatprep.subr.bf16.mxu0 %v1452_v8 }
 0x40c   : > { %2487 = vmatpush3.bf16.xpose.msra.mxu0 %v1452_v8 }
 0x413   : > { %2489 = vmatmul.mubr.bf16.vlgmr.msra.gmra.mrb[16].mxu0 %v1450_v1 }
 0x414   : > { %2496 = vmatprep.mubr.msk.bf16.mxu0 %vm975_vm1, %v3272_v22 }
 0x4e6   : > { %v2490_v34 = vpop.f32.mrb[16].mxu0 }
 0x4e7   : > { %v1487_v26 = vpop.f32.mrb[17].mxu0  ;;  %v1504_v40 = vsel %vm509_vm8, %v2490_v34, -1e+30 }
 0x4e8   : > { %v1502_v29 = vsel %vm507_vm6, %v1487_v26, -1e+30  ;;  %v2491_v35 = vpop.f32.mrb[18].mxu0  ;;  %v1512_v43 = vsel %vm975_vm1, %v1504_v40, -inf }
 0x4e9   : > { %v1490_v36 = vpop.f32.mrb[19].mxu0  ;;  %v1506_v37 = vsel %vm975_vm1, %v1502_v29, -inf  ;;  %v1505_v44 = vsel %vm510_vm9, %v2491_v35, -1e+30 }
 0x4ea   : > { %v1503_v41 = vsel %vm508_vm7, %v1490_v36, -1e+30  ;;  %1507 = vmax.xlane.f32.xlu0 %v1506_v37  ;;  %v1515_v45 = vsel %vm975_vm1, %v1505_v44, -inf }
 0x4eb   : > { %v1509_v42 = vsel %vm975_vm1, %v1503_v41, -inf }
 0x4ec   : > { %1510 = vmax.xlane.f32.xlu1 %v1509_v42 }
 0x4ee   : > { %1513 = vmax.xlane.f32.xlu0 %v1512_v43 }
 0x4f2   : > { %1516 = vmax.xlane.f32.xlu0 %v1515_v45 }
 0x577   : > { %v1508_v46 = vpop.xlane.xlu0 %1507 }
 0x578   : > { %v1518_v47 = vsub.f32 %v1502_v29, %v1508_v46 }
 0x579   : > { %v1511_v49 = vpop.xlane.xlu1 %1510 }
 0x57a   : > { %v1522_v50 = vmul.f32 1.442695, %v1518_v47  ;;  %v1519_v51 = vsub.f32 %v1503_v41, %v1511_v49 }
 0x57b   : > { %v1514_v52 = vpop.xlane.xlu0 %1513 }
 0x57c   : > { %2679 = vpow2.f32 %v1522_v50  ;;  %v1524_v53 = vmul.f32 1.442695, %v1519_v51  ;;  %v1520_v55 = vsub.f32 %v1504_v40, %v1514_v52 }
 0x57e   : > { %2681 = vpow2.f32 %v1524_v53  ;;  %v1526_v56 = vmul.f32 1.442695, %v1520_v55 }
 0x57f   : > { %v1517_v57 = vpop.xlane.xlu0 %1516 }
 0x580   : > { %2683 = vpow2.f32 %v1526_v56  ;;  %v1521_v58 = vsub.f32 %v1505_v44, %v1517_v57 }
 0x582   : > { %v1528_v59 = vmul.f32 1.442695, %v1521_v58 }
 0x584   : > { %2685 = vpow2.f32 %v1528_v59  ;;  %v2629_v59 = vld [vmem:[%s3441_s2] sm:$0xff]  }
 0x586   : > { %v2680_v61 = vpop.eup %2679 }
 0x587   : > { %v1530_v62 = vsel %vm975_vm1, %v2680_v61, 0.0 }
 0x588   : > { %v2682_v63 = vpop.eup %2681  ;;  %1531 = vadd.xlane.f32.xlu1 %v1530_v62 }
 0x589   : > { %v1533_v0 = vsel %vm975_vm1, %v2682_v63, 0.0 }
 0x58a   : > { %v2684_v1 = vpop.eup %2683  ;;  %1534 = vadd.xlane.f32.xlu0 %v1533_v0 }
 0x58b   : > { %v1536_v2 = vsel %vm975_vm1, %v2684_v1, 0.0 }
 0x58c   : > { %1537 = vadd.xlane.f32.xlu1 %v1536_v2  ;;  %v2630_v2 = vld [vmem:[%s3441_s2 + $0x8] sm:$0xff]  }
 0x58e   : > { %v2686_v3 = vpop.eup %2685 }
 0x58f   : > { %v1539_v5 = vsel %vm975_vm1, %v2686_v3, 0.0 }
 0x590   : > { %1855 = vadd.xlane.f32.xlu1 %v1851_v4  ;;  %1540 = vadd.xlane.f32.xlu0 %v1539_v5 }
 0x594   : > { %1859 = vadd.xlane.f32.xlu1 %v1853_v6  ;;  %1857 = vadd.xlane.f32.xlu0 %v1852_v7 }
 0x598   : > { %1831 = vadd.xlane.f32.xlu1 %v1827_v18  ;;  %1861 = vadd.xlane.f32.xlu0 %v1854_v9 }
 0x59c   : > { %1835 = vadd.xlane.f32.xlu1 %v1829_v10  ;;  %1833 = vadd.xlane.f32.xlu0 %v1828_v13 }
 0x5a0   : > { %1837 = vadd.xlane.f32.xlu0 %v1830_v15 }
 0x615   : > { %v1532_v25 = vpop.xlane.xlu1 %1531 }
 0x616   : > { %2687 = vrcp.f32 %v1532_v25 }
 0x617   : > { %v1535_v28 = vpop.xlane.xlu0 %1534 }
 0x618   : > { %2689 = vrcp.f32 %v1535_v28 }
 0x619   : > { %v1538_v16 = vpop.xlane.xlu1 %1537 }
 0x61a   : > { %2691 = vrcp.f32 %v1538_v16 }
 0x61d   : > { %v1856_v23 = vpop.xlane.xlu1 %1855  ;;  %v1541_v8 = vpop.xlane.xlu0 %1540 }
 0x61e   : > { %2693 = vrcp.f32 %v1541_v8  ;;  %v1863_v34 = vmax.f32 %v1856_v23, 1e-24 }
 0x620   : > { %v2688_v26 = vpop.eup %2687  ;;  %2695 = vrsqrt.f32 %v1863_v34 }
 0x621   : > { %v1860_v29 = vpop.xlane.xlu1 %1859  ;;  %v1858_v35 = vpop.xlane.xlu0 %1857  ;;  %v1546_v41 = vmul.f32 %v2688_v26, %v2680_v61 }
 0x622   : > { %v2690_v36 = vpop.eup %2689  ;;  %v1864_v37 = vmax.f32 %v1858_v35, 1e-24  ;;  %v1865_v40 = vmax.f32 %v1860_v29, 1e-24  ;;  %v2633_v35 = vld [vmem:[%s3024_s15 + $0x4] ss:$16 sps:$4 sm:$0xff]  }
 0x623   : > { %v1547_v42 = vmul.f32 %v2690_v36, %v2682_v63  ;;  %v3282_v63 = vld [vmem:[%s3450_s11 + $0x8] sm:$0xff]   ;;  %1738 = vmatprep.subr.bf16.mxu1 %v2633_v35 }
 0x624   : > { %2697 = vrsqrt.f32 %v1864_v37  ;;  %v2692_v46 = vpop.eup %2691 }
 0x625   : > { %v1832_v43 = vpop.xlane.xlu1 %1831  ;;  %v1862_v44 = vpop.xlane.xlu0 %1861  ;;  %v1550_v45 = vpack.c.bf16 %v1547_v42, %v1546_v41  ;;  %2699 = vrsqrt.f32 %v1865_v40  ;;  %v1548_v53 = vmul.f32 %v2692_v46, %v2684_v1 }
 0x626   : > { %v1839_v47 = vmax.f32 %v1832_v43, 1e-24  ;;  %v1866_v49 = vmax.f32 %v1862_v44, 1e-24 }
 0x627   : > { %2492 = vmatprep.subr.bf16.mxu0 %v1550_v45 }
 0x628   : > { %v2694_v50 = vpop.eup %2693  ;;  %2701 = vrsqrt.f32 %v1839_v47  ;;  %2493 = vmatpush3.bf16.msra.mxu0 %v1550_v45 }
 0x629   : > { %2703 = vrsqrt.f32 %v1866_v49  ;;  %v1836_v51 = vpop.xlane.xlu1 %1835  ;;  %v1834_v52 = vpop.xlane.xlu0 %1833  ;;  %v1549_v55 = vmul.f32 %v2694_v50, %v2686_v3 }
 0x62a   : > { %v1841_v56 = vmax.f32 %v1836_v51, 1e-24  ;;  %v1840_v57 = vmax.f32 %v1834_v52, 1e-24  ;;  %v2696_v61 = vpop.eup %2695 }
 0x62b   : > { %v1551_v58 = vpack.c.bf16 %v1549_v55, %v1548_v53  ;;  %v1871_v3 = vmul.f32 %v2696_v61, %v3151_v21 }
 0x62c   : > { %2705 = vrsqrt.f32 %v1841_v56 }
 0x62d   : > { %2707 = vrsqrt.f32 %v1840_v57  ;;  %2494 = vmatprep.subr.bf16.mxu0 %v1551_v58  ;;  %v1838_v62 = vpop.xlane.xlu0 %1837 }
 0x62e   : > { %v1842_v0 = vmax.f32 %v1838_v62, 1e-24  ;;  %2495 = vmatpush3.bf16.msra.mxu0 %v1551_v58  ;;  %v2698_v1 = vpop.eup %2697 }
 0x62f   : > { %2500 = vmatprep.subr.bf16.mxu0 %v2629_v59  ;;  %v1872_v4 = vmul.f32 %v2698_v1, %v3157_v24  ;;  %v2700_v5 = vpop.eup %2699 }
 0x630   : > { %2709 = vrsqrt.f32 %v1842_v0  ;;  %v1873_v9 = vmul.f32 %v2700_v5, %v3163_v27 }
 0x631   : > { %2497 = vmatmul.mubr.msk.bf16.vlgmr.msra.gmra.mrb[20].mxu0 %vm975_vm1, %v3282_v63  ;;  %v1881_v7 = vpack.c.bf16 %v1872_v4, %v1871_v3 }
 0x632   : > { %v2702_v6 = vpop.eup %2701  ;;  %2501 = vmatpush3.bf16.msra.mxu0 %v2629_v59 }
 0x633   : > { %v2704_v18 = vpop.eup %2703  ;;  %2502 = vmatprep.subr.bf16.mxu0 %v2630_v2  ;;  %v1847_v24 = vmul.f32 %v2702_v6, %v3135_v17  ;;  %v2631_v17 = vld [vmem:[%s3024_s15] ss:$16 sps:$4 sm:$0xff]  }
 0x634   : > { %v1874_v10 = vmul.f32 %v2704_v18, %v3169_v30  ;;  %1739 = vmatpush1.bf16.msra.mxu1 %v2631_v17 }
 0x635   : > { %v1875_v23 = vmul.f32 %v1847_v24, %v3194_v39  ;;  %v1366_v24 = vld [vmem:[%s3451_s12 + $0x8] sm:$0xff] }
 0x636   : > { %v2706_v13 = vpop.eup %2705  ;;  %2503 = vmatpush3.bf16.msra.mxu0 %v2630_v2  ;;  %v1882_v21 = vpack.c.bf16 %v1874_v10, %v1873_v9 }
 0x637   : > { %v2708_v15 = vpop.eup %2707  ;;  %2508 = vmatprep.subr.bf16.mxu0 %v1881_v7  ;;  %v1849_v28 = vmul.f32 %v2706_v13, %v3145_v11  ;;  %v1365_v13 = vld [vmem:[%s3451_s12] sm:$0xff] }
 0x638   : > { %v1848_v25 = vmul.f32 %v2708_v15, %v3141_v20  ;;  %v1368_v15 = vld [vmem:[%s3451_s12 + $0x18] sm:$0xff] }
 0x639   : > { %v1877_v34 = vmul.f32 %v1849_v28, %v3196_v54  ;;  %v2636_v54 = vld [vmem:[%s3024_s15 + $0x24] ss:$16 sps:$4 sm:$0xff]  }
 0x63a   : > { %v2710_v16 = vpop.eup %2709  ;;  %v1876_v27 = vmul.f32 %v1848_v25, %v3206_v12  ;;  %1740 = vmatprep.subr.bf16.mxu1 %v2636_v54 }
 0x63b   : > { %v1850_v30 = vmul.f32 %v2710_v16, %v3147_v14  ;;  %v2634_v14 = vld [vmem:[%s3024_s15 + $0x20] ss:$16 sps:$4 sm:$0xff]  }
 0x63c   : > { %v1879_v8 = vpack.c.bf16 %v1876_v27, %v1875_v23  ;;  %1741 = vmatpush1.bf16.msra.mxu1 %v2634_v14 }
 0x63d   : > { %v1878_v26 = vmul.f32 %v1850_v30, %v3198_v60 }
 0x63f   : > { %v1880_v29 = vpack.c.bf16 %v1878_v26, %v1877_v34 }
 0x704   : > { %v2498_v20 = vpop.f32.mrb[20].mxu0 }
 0x705   : > { %v1602_v36 = vpop.f32.mrb[21].mxu0 }
 0x706   : > { %v2499_v11 = vpop.f32.mrb[22].mxu0 }
 0x707   : > { %v1618_v39 = vpack.c.bf16 %v2499_v11, %v2498_v20  ;;  %v1605_v37 = vpop.f32.mrb[23].mxu0 }
 0x708   : > { %v1617_v12 = vpack.c.bf16 %v1605_v37, %v1602_v36 }
 0x70a   : > { %2504 = vmatprep.mubr.msk.bf16.mxu0 %vm975_vm1, %v1617_v12 }
 0x70b   : > { %2505 = vmatmul.mubr.msk.bf16.vlgmr.msra.gmra.mrb[24].mxu0 %vm975_vm1, %v1618_v39 }
 0x70c   : > { %2509 = vmatpush3.bf16.xpose.msra.mxu0 %v1881_v7  ;;  %2512 = vmatprep.mubr.bf16.mxu0 %v1879_v8 }
 0x70d   : > { %2510 = vmatprep.subr.bf16.mxu0 %v1882_v21 }
 0x714   : > { %2511 = vmatpush3.bf16.xpose.msra.mxu0 %v1882_v21  ;;  %v1367_v21 = vld [vmem:[%s3451_s12 + $0x10] sm:$0xff] }
 0x715   : > { %2524 = vmatprep.subr.bf16.mxu0 %v2629_v59 }
 0x71b   : > { %2513 = vmatmul.mubr.bf16.vlgmr.msra.gmra.mrb[28].mxu0 %v1880_v29 }
 0x71c   : > { %2525 = vmatpush3.bf16.msra.mxu0 %v2629_v59 }
 0x71d   : > { %2526 = vmatprep.subr.bf16.mxu0 %v2630_v2 }
 0x720   : > { %2527 = vmatpush3.bf16.msra.mxu0 %v2630_v2 }
 0x7de   : > { %v2506_v60 = vpop.f32.mrb[24].mxu0 }
 0x7df   : > { %v1671_v40 = vpop.f32.mrb[25].mxu0 }
 0x7e0   : > { %v2507_v41 = vpop.f32.mrb[26].mxu0 }
 0x7e1   : > { %v1691_v42 = vpack.c.bf16 %v2507_v41, %v2506_v60  ;;  %v1674_v43 = vpop.f32.mrb[27].mxu0 }
 0x7e2   : > { %v1690_v44 = vpack.c.bf16 %v1674_v43, %v1671_v40 }
 0x7e4   : > { %2369 = vmatmul.mubr.msk.bf16.vlgmr.msra.gmra.mrb[24].mxu1 %vm975_vm1, %v1690_v44 }
 0x7e5   : > { %1780 = vmatprep.mubr.bf16.mxu1 %v2791_v48 }
 0x7ec   : > { %2370 = vmatmul.mubr.msk.bf16.gmra.mrb[28].mxu1 %vm975_vm1, %v1691_v42 }
 0x7ed   : > { %2520 = vmatprep.mubr.msk.bf16.mxu1 %vm975_vm1, %v3272_v22 }
 0x7ee   : > { %v2514_v45 = vpop.f32.mrb[28].mxu0 }
 0x7ef   : > { %v1917_v46 = vpop.f32.mrb[29].mxu0  ;;  %v1934_v52 = vsel %vm509_vm8, %v2514_v45, -1e+30 }
 0x7f0   : > { %v1932_v47 = vsel %vm507_vm6, %v1917_v46, -1e+30  ;;  %v2515_v49 = vpop.f32.mrb[30].mxu0  ;;  %v1942_v55 = vsel %vm975_vm1, %v1934_v52, -inf }
 0x7f1   : > { %v1920_v50 = vpop.f32.mrb[31].mxu0  ;;  %v1936_v51 = vsel %vm975_vm1, %v1932_v47, -inf  ;;  %v1935_v19 = vsel %vm510_vm9, %v2515_v49, -1e+30 }
 0x7f2   : > { %v1933_v53 = vsel %vm508_vm7, %v1920_v50, -1e+30  ;;  %1937 = vmax.xlane.f32.xlu1 %v1936_v51  ;;  %v1945_v56 = vsel %vm975_vm1, %v1935_v19, -inf }
 0x7f3   : > { %v1939_v22 = vsel %vm975_vm1, %v1933_v53, -inf }
 0x7f4   : > { %1940 = vmax.xlane.f32.xlu0 %v1939_v22 }
 0x7f6   : > { %1943 = vmax.xlane.f32.xlu1 %v1942_v55 }
 0x7f8   : > { %1946 = vmax.xlane.f32.xlu0 %v1945_v56 }
 0x87f   : > { %v1938_v33 = vpop.xlane.xlu1 %1937 }
 0x880   : > { %v1948_v57 = vsub.f32 %v1932_v47, %v1938_v33  ;;  %v2637_v33 = vld [vmem:[%s3024_s15 + $0x8] ss:$16 sps:$4 sm:$0xff]  }
 0x881   : > { %v1941_v58 = vpop.xlane.xlu0 %1940 }
 0x882   : > { %v1952_v59 = vmul.f32 1.442695, %v1948_v57  ;;  %v1949_v31 = vsub.f32 %v1933_v53, %v1941_v58  ;;  %v2639_v57 = vld [vmem:[%s3024_s15 + $0xc] ss:$16 sps:$4 sm:$0xff]  }
 0x883   : > { %v1944_v61 = vpop.xlane.xlu1 %1943 }
 0x884   : > { %2711 = vpow2.f32 %v1952_v59  ;;  %v1954_v62 = vmul.f32 1.442695, %v1949_v31  ;;  %v1950_v0 = vsub.f32 %v1934_v52, %v1944_v61 }
 0x885   : > { %v1947_v1 = vpop.xlane.xlu0 %1946 }
 0x886   : > { %2713 = vpow2.f32 %v1954_v62  ;;  %v1956_v32 = vmul.f32 1.442695, %v1950_v0  ;;  %v1951_v38 = vsub.f32 %v1935_v19, %v1947_v1  ;;  %v2640_v1 = vld [vmem:[%s3024_s15 + $0x28] ss:$16 sps:$4 sm:$0xff]  }
 0x888   : > { %2715 = vpow2.f32 %v1956_v32  ;;  %v1958_v2 = vmul.f32 1.442695, %v1951_v38  ;;  %v2642_v32 = vld [vmem:[%s3024_s15 + $0x2c] ss:$16 sps:$4 sm:$0xff]   ;;  %s2403_s15 = sshll.u32 %s3464_s24, 8  ;;  %s2733_s24 = scalar_lea.vmem %s2732_s23, 2048 }
 0x889   : > { %s3389_s16 = scalar_lea.hbm %s3452_s13, %s2403_s15  ;;  %p2735_p3 = scmp.lt.s32.totalorder %s2733_s24, %s2727_s22 }
 0x88a   : > { %2717 = vpow2.f32 %v1958_v2 }
 0x88b   : > { %p2736_p4 = por %p2735_p3, %p2734_p2 }
 0x88d   : > { %p2737_p5 = pnand %p2736_p4, %p2730_p1 }
 0x88e   : > { %v2712_v3 = vpop.eup %2711 }
 0x88f   : > { %v1960_v4 = vsel %vm975_vm1, %v2712_v3, 0.0 }
 0x890   : > { %v2714_v5 = vpop.eup %2713  ;;  %1961 = vadd.xlane.f32.xlu1 %v1960_v4 }
 0x891   : > { %v1963_v6 = vsel %vm975_vm1, %v2714_v5, 0.0 }
 0x892   : > { %v2716_v7 = vpop.eup %2715  ;;  %1964 = vadd.xlane.f32.xlu0 %v1963_v6 }
 0x893   : > { %v1966_v18 = vsel %vm975_vm1, %v2716_v7, 0.0 }
 0x894   : > { %v2718_v9 = vpop.eup %2717  ;;  %1967 = vadd.xlane.f32.xlu1 %v1966_v18 }
 0x895   : > { %v1969_v10 = vsel %vm975_vm1, %v2718_v9, 0.0 }
 0x896   : > { %1970 = vadd.xlane.f32.xlu0 %v1969_v10 }
 0x8a5   : > { %1694 = vperm.xlu1 %2576, %v1365_v13  }
 0x8a9   : > { %1704 = vperm.xlu1 %2576, %v1367_v21  }
 0x8ac   : > { %1699 = vperm.xlu0 %2575, %v1366_v24  }
 0x8ad   : > { %1709 = vperm.xlu1 %2576, %v1368_v15  }
 0x8b7   : > { %v1772_v25 = vpop.f32.mrb[24].mxu1 }
 0x8b8   : > { %v1774_v28 = vpop.f32.mrb[25].mxu1 }
 0x8b9   : > { %v1776_v16 = vpop.f32.mrb[26].mxu1 }
 0x8ba   : > { %v1778_v23 = vpop.f32.mrb[27].mxu1 }
 0x8bf   : > { %v1782_v27 = vpop.f32.mrb[28].mxu1 }
 0x8c0   : > { %v1784_v30 = vpop.f32.mrb[29].mxu1 }
 0x8c1   : > { %v1786_v8 = vpop.f32.mrb[30].mxu1 }
 0x8c2   : > { %v1788_v34 = vpop.f32.mrb[31].mxu1 }
 0x91d   : > { %v1962_v26 = vpop.xlane.xlu1 %1961 }
 0x91e   : > { %2719 = vrcp.f32 %v1962_v26 }
 0x91f   : > { %v1965_v29 = vpop.xlane.xlu0 %1964 }
 0x920   : > { %2721 = vrcp.f32 %v1965_v29 }
 0x921   : > { %v1968_v17 = vpop.xlane.xlu1 %1967 }
 0x922   : > { %2723 = vrcp.f32 %v1968_v17 }
 0x923   : > { %v1971_v35 = vpop.xlane.xlu0 %1970 }
 0x924   : > { %2725 = vrcp.f32 %v1971_v35 }
 0x925   : > { %v3344_v20 = vpop.permute.xlu1 %1694 }
 0x926   : > { %v1773_v36 = vadd.f32 %v1772_v25, %v3344_v20  ;;  %v1775_v11 = vadd.f32 %v1774_v28, %v3344_v20 }
 0x928   : > { %v2720_v39 = vpop.eup %2719  ;;  %v2395_v37 = vpack.c.bf16 %v1775_v11, %v1773_v36 }
 0x929   : > { %v3348_v12 = vpop.permute.xlu1 %1704  ;;  %v1976_v41 = vmul.f32 %v2720_v39, %v2712_v3 }
 0x92a   : > { %v2722_v14 = vpop.eup %2721  ;;  %1815 = vst [vmem:[%s3351_s17] sm:$0xff] %v2395_v37  ;;  %v1783_v54 = vadd.f32 %v1782_v27, %v3348_v12  ;;  %v1785_v60 = vadd.f32 %v1784_v30, %v3348_v12 }
 0x92b   : > { %v1700_v40 = vpop.permute.xlu0 %1699  ;;  %v1977_v42 = vmul.f32 %v2722_v14, %v2714_v5 }
 0x92c   : > { %v2724_v43 = vpop.eup %2723  ;;  %v2397_v44 = vpack.c.bf16 %v1785_v60, %v1783_v54  ;;  %v1777_v45 = vadd.f32 %v1776_v16, %v1700_v40  ;;  %v1779_v46 = vadd.f32 %v1778_v23, %v1700_v40 }
 0x92d   : > { %v3356_v47 = vpop.permute.xlu1 %1709  ;;  %v1980_v49 = vpack.c.bf16 %v1977_v42, %v1976_v41  ;;  %v1978_v22 = vmul.f32 %v2724_v43, %v2716_v7 }
 0x92e   : > { %v2726_v50 = vpop.eup %2725  ;;  %1817 = vst [vmem:[%s3351_s17 + $0x20] sm:$0xff] %v2397_v44  ;;  %v2396_v51 = vpack.c.bf16 %v1779_v46, %v1777_v45  ;;  %v1787_v52 = vadd.f32 %v1786_v8, %v3356_v47  ;;  %v1789_v53 = vadd.f32 %v1788_v34, %v3356_v47 }
 0x92f   : > { %2516 = vmatprep.subr.bf16.mxu1 %v1980_v49  ;;  %v1979_v19 = vmul.f32 %v2726_v50, %v2718_v9 }
 0x930   : > { %1816 = vst [vmem:[%s3351_s17 + $0x10] sm:$0xff] %v2396_v51  ;;  %v2398_v55 = vpack.c.bf16 %v1789_v53, %v1787_v52  ;;  %2517 = vmatpush3.bf16.msra.mxu1 %v1980_v49 }
 0x931   : > { %v1981_v56 = vpack.c.bf16 %v1979_v19, %v1978_v22 }
 0x932   : > { %1818 = vst [vmem:[%s3351_s17 + $0x30] sm:$0xff] %v2398_v55 }
 0x933   : > { %2518 = vmatprep.subr.bf16.mxu1 %v1981_v56 }
 0x934   : > { %2519 = vmatpush3.bf16.msra.mxu1 %v1981_v56 }
 0x935   : > { %2120 = vmatprep.subr.bf16.mxu1 %v2639_v57 }
 0x937   : > { %2521 = vmatmul.mubr.msk.bf16.vlgmr.msra.gmra.mrb[32].mxu1 %vm975_vm1, %v3282_v63 }
 0x938   : > { %2152 = vmatprep.mubr.bf16.mxu1 %v2791_v48  ;;  %2121 = vmatpush1.bf16.msra.mxu1 %v2637_v33 }
 0x939   : > { %2122 = vmatprep.subr.bf16.mxu1 %v2642_v32 }
 0x93c   : > { %2123 = vmatpush1.bf16.msra.mxu1 %v2640_v1 }
 0xa0a   : > { %v2522_v58 = vpop.f32.mrb[32].mxu1 }
 0xa0b   : > { %v2016_v59 = vpop.f32.mrb[33].mxu1 }
 0xa0c   : > { %v2523_v31 = vpop.f32.mrb[34].mxu1 }
 0xa0d   : > { %v2032_v61 = vpack.c.bf16 %v2523_v31, %v2522_v58  ;;  %v2019_v62 = vpop.f32.mrb[35].mxu1 }
 0xa0e   : > { %v2031_v0 = vpack.c.bf16 %v2019_v62, %v2016_v59 }
 0xa10   : > { %2528 = vmatprep.mubr.msk.bf16.mxu0 %vm975_vm1, %v2031_v0 }
 0xa11   : > { %2529 = vmatmul.mubr.msk.bf16.vlgmr.msra.gmra.mrb[32].mxu0 %vm975_vm1, %v2032_v61 }
 0xae4   : > { %v2530_v63 = vpop.f32.mrb[32].mxu0 }
 0xae5   : > { %v2073_v38 = vpop.f32.mrb[33].mxu0 }
 0xae6   : > { %v2531_v2 = vpop.f32.mrb[34].mxu0 }
 0xae7   : > { %v2093_v3 = vpack.c.bf16 %v2531_v2, %v2530_v63  ;;  %v2076_v4 = vpop.f32.mrb[35].mxu0 }
 0xae8   : > { %v2092_v5 = vpack.c.bf16 %v2076_v4, %v2073_v38 }
 0xaea   : > { %2383 = vmatmul.mubr.msk.bf16.vlgmr.msra.gmra.mrb[36].mxu1 %vm975_vm1, %v2092_v5 }
 0xaeb   : > { %2162 = vmatprep.mubr.bf16.mxu1 %v2791_v48 }
 0xaf2   : > { %2384 = vmatmul.mubr.msk.bf16.gmra.mrb[40].mxu1 %vm975_vm1, %v2093_v3 }
 0xbbd   : > { %v2154_v6 = vpop.f32.mrb[36].mxu1 }
 0xbbe   : > { %v2155_v7 = vadd.f32 %v2154_v6, %v3344_v20  ;;  %v2156_v18 = vpop.f32.mrb[37].mxu1 }
 0xbbf   : > { %v2157_v9 = vadd.f32 %v2156_v18, %v3344_v20  ;;  %v2158_v10 = vpop.f32.mrb[38].mxu1 }
 0xbc0   : > { %v2159_v13 = vadd.f32 %v2158_v10, %v1700_v40  ;;  %v2160_v21 = vpop.f32.mrb[39].mxu1 }
 0xbc1   : > { %v2399_v24 = vpack.c.bf16 %v2157_v9, %v2155_v7  ;;  %v2161_v15 = vadd.f32 %v2160_v21, %v1700_v40 }
 0xbc3   : > { %2197 = vst [vmem:[%s3351_s17 + $0x8] sm:$0xff] %v2399_v24  ;;  %v2400_v25 = vpack.c.bf16 %v2161_v15, %v2159_v13 }
 0xbc5   : > { %2198 = vst [vmem:[%s3351_s17 + $0x18] sm:$0xff] %v2400_v25  ;;  %v2164_v48 = vpop.f32.mrb[40].mxu1 }
 0xbc6   : > { %v2165_v28 = vadd.f32 %v2164_v48, %v3348_v12  ;;  %v2166_v16 = vpop.f32.mrb[41].mxu1 }
 0xbc7   : > { %v2167_v23 = vadd.f32 %v2166_v16, %v3348_v12  ;;  %v2168_v27 = vpop.f32.mrb[42].mxu1 }
 0xbc8   : > { %v2169_v30 = vadd.f32 %v2168_v27, %v3356_v47  ;;  %v2170_v8 = vpop.f32.mrb[43].mxu1 }
 0xbc9   : > { %v2401_v34 = vpack.c.bf16 %v2167_v23, %v2165_v28  ;;  %v2171_v26 = vadd.f32 %v2170_v8, %v3356_v47 }
 0xbcb   : > { %2199 = vst [vmem:[%s3351_s17 + $0x28] sm:$0xff] %v2401_v34  ;;  %v2402_v29 = vpack.c.bf16 %v2171_v26, %v2169_v30 }
 0xbcd   : > { %2200 = vst [vmem:[%s3351_s17 + $0x38] sm:$0xff] %v2402_v29 }
 0xbce   : > { %2740 = shalt.err (!%p2737_p5)
}
 0xbcf   : > { %s2741_s17 = scalar_lea.hbm %s3389_s16, 1024  ;;  %s2745_s29 = scalar_lea.hbm %s3452_s13, 2048 }
 0xbd0   : > { %p2742_p7 = scmp.ne.s32.totalorder %s3389_s16, %s2741_s17  ;;  %p2746_p12 = scmp.lt.u32.totalorder %s3389_s16, %s3452_s13 }
 0xbd1   : > { %p2747_p13 = scmp.lt.u32.totalorder %s2745_s29, %s2741_s17  ;;  %p2749_p1 = scmp.lt.u32.totalorder %s2741_s17, %s3389_s16 }
 0xbd2   : > { %p2743_p10 = pnand %p2742_p7, %p2904_p6 }
 0xbd3   : > { %p2748_p0 = por %p2747_p13, %p2746_p12 }
 0xbd4   : > { %p2744_p11 = pneg %p2743_p10 }
 0xbd5   : > { %p2750_p2 = por %p2749_p1, %p2748_p0 }
 0xbd7   : > { %p2751_p3 = pnand %p2750_p2, %p2744_p11 }
 0xbd9   : > { %2754 = shalt.err (!%p2751_p3)
}
 0xbda   : > { %s2793_s22 = smov 256   ;;  %s2794_s23 = smov 512  }
 0xbdb   : > { %s2795_s24 = smov 16  }
 0xbdc   : > { %2532 = dma.vmem_to_hbm [thread:$0]  (%p2904_p6), %s3391_s0, 1024, %s3389_s16, %s3397_s21, %s2793_s22, %s2794_s23, %s2795_s24  }
 0xbdd PF: > { %s2230_s15 = sand.u32 1, %s2777_s25   ;;  %p2535_p4 = pnand %p2285_p9, %p2908_p8 }
 0xbde   : > { %s2231_s17 = scalar_lea.sflag [#allocation6], %s2230_s15 }
 0xbdf   : > { %2772 = dma.done.wait (!%p2535_p4), %s2231_s17, 1024  }
 0xbe0   : > { %2774 = vsyncadd (!%p2535_p4), %s2231_s17, 4294966272  ;;  %s3466_s30 = sld [smem:[#allocation8_spill]]  ;;  %p23_p5 = scmp.ge.s32.totalorder %s2889_s14, 4  }
 0xbe1   : > { %s3467_s25 = smov %s2781_s26  ;;  %s3468_s26 = smov %s2785_s27 }
 0xbe2   : > { %s3470_s28 = smov %s2889_s14  ;;  %25 = sbr.rel (!%p23_p5) target bundleno = 6 (0x6), region = 135 }
 0xbe6   : > { %s3469_s27 = smov %s3466_s30 }
 0xbe9   :  { %2236 = vsyncpa [#allocation6], 1 }
 0xbea   :  { %2238 = vsyncpa [#allocation6 + $0x1], 1 }

</bundles_post_ra>
